<compile_context>
chip_gen: v7x
topology: tpu7x:2x2x1
jax: 0.10.0
libtpu: 0.0.40
codegen_flags: <defaults>
</compile_context>

<pallas_src>
import functools

import jax
import jax.numpy as jnp
from jax.experimental import pallas as pl
from jax.experimental.pallas import tpu as pltpu

INPUT_SIZE = 64
HIDDEN = 128
NUM_CLASSES = 40
FC_PAD = 128     # lane-dense classifier width (real outputs = first 40 lanes)


def rnn_kernel(x_ref, wih0p_ref, b01_ref, wrec_ref, wfc_ref, bfc_ref, out_ref,
               *, batch, seq_len):
    """Skew-fused 2-layer tanh RNN + classifier for one batch block.

    x_ref    : (batch*T, 64)  f32   batch-major rows (row = b*T + t)
    wih0p_ref: (64, 256)      bf16  [W_ih0^T | 0]   (layer-0 input proj, padded to 256 lanes)
    b01_ref  : (1, 256)       f32   [b_ih0+b_hh0 | b_ih1+b_hh1]
    wrec_ref : (256, 256)     bf16  [[W_hh0^T, W_ih1^T], [0, W_hh1^T]]  (skew-fused weight)
    wfc_ref  : (128, 128)     bf16  W_fc^T zero-padded to 128 output lanes
    bfc_ref  : (1, 128)       f32   b_fc zero-padded
    out_ref  : (batch, 128)   f32   padded logits (first NUM_CLASSES lanes are real)
    """
    H2 = 2 * HIDDEN

    # One-shot layer-0 projection (+ both biases) for ALL timesteps: (B*T,64)@(64,256).
    # The right 128 weight lanes are zero, so addt[..., 128:] == b1 exactly.
    x_bf = x_ref[...].astype(jnp.bfloat16)
    addt = (jnp.dot(x_bf, wih0p_ref[...], preferred_element_type=jnp.float32)
            + b01_ref[...]).reshape(batch, seq_len, H2)            # (B, T, 256)

    # Carry hcat(t) = [h0(t) | h1(t-1)]  (B, 256) f32.
    # Prologue (t = 0): h0(0) = tanh(x0 W_ih0^T + b0);  h1(-1) = 0 (initial state).
    hcat = jnp.concatenate(
        [jnp.tanh(addt[:, 0, :HIDDEN]),
         jnp.zeros((batch, HIDDEN), jnp.float32)], axis=1)

    # Main loop (t = 1..T-1): one (B,256)@(256,256) MXU pass + one (B,256) tanh per step.
    #   left  half: x_t W_ih0^T + b0 + h0(t-1) W_hh0^T                  -> h0(t)
    #   right half: h0(t-1) W_ih1^T + h1(t-2) W_hh1^T + b1              -> h1(t-1)
    # wrec_ref is indexed inside the dot (not hoisted) so the weight streams from VMEM
    # instead of living in vregs across the unrolled loop.
    for t in range(1, seq_len):
        a = jnp.dot(hcat.astype(jnp.bfloat16), wrec_ref[...],
                    preferred_element_type=jnp.float32)
        hcat = jnp.tanh(a + addt[:, t, :])
    # TODO(synk): on v6e/v7x, keep wrec resident in MXU weight staging
    # (pltpu.matmul_push_rhs once + matmul_acc_lhs/matmul_pop per step) to drop the
    # per-step weight push from the serial chain.

    # Epilogue: last layer-1 step.
    #   h1(T-1) = tanh(h0(T-1) W_ih1^T + h1(T-2) W_hh1^T + b1) = tanh(right half + b1).
    a_ep = jnp.dot(hcat.astype(jnp.bfloat16), wrec_ref[...],
                   preferred_element_type=jnp.float32)
    h1_last = jnp.tanh(a_ep[:, HIDDEN:] + b01_ref[:, HIDDEN:])

    # Classifier: lane-dense 128-wide store (pad lanes are exactly zero).
    out_ref[...] = (jnp.dot(h1_last.astype(jnp.bfloat16), wfc_ref[...],
                            preferred_element_type=jnp.float32)
                    + bfc_ref[...])


@jax.jit
def rnn_forward_padded(x, wih0p_t, b01, wrec_t, wfc_t, bfc):
    """x: (B, T, 64) f32 batch_first. Returns (B, 128) padded logits (first 40 lanes real)."""
    B, T, D = x.shape
    assert D == INPUT_SIZE
    assert B % 8 == 0, "batch must be a multiple of 8 (sublanes) for clean tiles"
    # Free metadata reshape (no transpose, no extra HBM round trip): row = b*T + t.
    x2 = x.reshape(B * T, D)

    # Batch grid: single block at small B; split in two when B >= 16 so v7x's two
    # TensorCores each run an independent recurrence (each still >= 8 sublanes of batch).
    block_b = B // 2 if (B >= 16 and B % 16 == 0) else B
    grid = (B // block_b,)

    out_pad = pl.pallas_call(
        functools.partial(rnn_kernel, batch=block_b, seq_len=T),
        out_shape=jax.ShapeDtypeStruct((B, FC_PAD), jnp.float32),
        grid=grid,
        in_specs=[
            pl.BlockSpec((block_b * T, INPUT_SIZE), lambda i: (i, 0)),   # x rows per batch block
            pl.BlockSpec((INPUT_SIZE, 2 * HIDDEN), lambda i: (0, 0)),    # wih0p (replicated)
            pl.BlockSpec((1, 2 * HIDDEN), lambda i: (0, 0)),             # b01
            pl.BlockSpec((2 * HIDDEN, 2 * HIDDEN), lambda i: (0, 0)),    # wrec
            pl.BlockSpec((HIDDEN, FC_PAD), lambda i: (0, 0)),            # wfc
            pl.BlockSpec((1, FC_PAD), lambda i: (0, 0)),                 # bfc
        ],
        out_specs=pl.BlockSpec((block_b, FC_PAD), lambda i: (i, 0)),
        compiler_params=pltpu.CompilerParams(
            dimension_semantics=("parallel",)),
    )(x2, wih0p_t, b01, wrec_t, wfc_t, bfc)
    # TODO(synk): for large B*T, stage the (B,T,256) additive tensor in a bf16 VMEM scratch
    # sliced per step inside a fori_loop (and/or raise vmem_limit_bytes) to stay under
    # v7x's 64 MiB VMEM; a non-issue at these sizes.
    return out_pad


@jax.jit
def rnn_forward(x, wih0p_t, b01, wrec_t, wfc_t, bfc):
    """Module-equivalent forward: (B, T, 64) -> (B, 40) logits.

    The 40-lane cut is fused under this jit; latency-critical consumers should call
    rnn_forward_padded and slice/fuse downstream instead.
    """
    return rnn_forward_padded(x, wih0p_t, b01, wrec_t, wfc_t, bfc)[:, :NUM_CLASSES]


def init_params(key):
    """Deterministic init matching PyTorch shapes (uniform +-1/sqrt(hidden))."""
    ks = jax.random.split(key, 10)
    bound = 1.0 / jnp.sqrt(HIDDEN)
    u = lambda k, shape: jax.random.uniform(k, shape, jnp.float32, -bound, bound)
    # nn.RNN layer 0
    w_ih0 = u(ks[0], (HIDDEN, INPUT_SIZE))
    w_hh0 = u(ks[1], (HIDDEN, HIDDEN))
    b_ih0 = u(ks[2], (HIDDEN,))
    b_hh0 = u(ks[3], (HIDDEN,))
    # nn.RNN layer 1
    w_ih1 = u(ks[4], (HIDDEN, HIDDEN))
    w_hh1 = u(ks[5], (HIDDEN, HIDDEN))
    b_ih1 = u(ks[6], (HIDDEN,))
    b_hh1 = u(ks[7], (HIDDEN,))
    # fc
    w_fc = u(ks[8], (NUM_CLASSES, HIDDEN))
    b_fc = u(ks[9], (NUM_CLASSES,))

    # Kernel-format params (all packing done host-side, once):
    # layer-0 projection padded to 256 output lanes (right half zero -> additive right half == b1).
    wih0p = jnp.zeros((INPUT_SIZE, 2 * HIDDEN), jnp.float32).at[:, :HIDDEN].set(w_ih0.T)
    b01 = jnp.concatenate([b_ih0 + b_hh0, b_ih1 + b_hh1])[None, :]
    # skew-fused recurrent weight: LHS = [h0(t-1) | h1(t-2)], RHS = [[Whh0^T, Wih1^T],[0, Whh1^T]].
    wrec = jnp.zeros((2 * HIDDEN, 2 * HIDDEN), jnp.float32)
    wrec = wrec.at[:HIDDEN, :HIDDEN].set(w_hh0.T)
    wrec = wrec.at[:HIDDEN, HIDDEN:].set(w_ih1.T)
    wrec = wrec.at[HIDDEN:, HIDDEN:].set(w_hh1.T)
    # classifier zero-padded to a lane-dense 128-wide output.
    wfc_pad = jnp.zeros((HIDDEN, FC_PAD), jnp.float32).at[:, :NUM_CLASSES].set(w_fc.T)
    bfc_pad = jnp.zeros((1, FC_PAD), jnp.float32).at[0, :NUM_CLASSES].set(b_fc)

    return dict(
        wih0p_t=wih0p.astype(jnp.bfloat16),
        b01=b01,
        wrec_t=wrec.astype(jnp.bfloat16),
        wfc_t=wfc_pad.astype(jnp.bfloat16),
        bfc=bfc_pad,
        raw=(w_ih0, w_hh0, b_ih0, b_hh0, w_ih1, w_hh1, b_ih1, b_hh1, w_fc, b_fc),
    )


def reference_forward(x, raw):
    """Pure-JAX f32 reference replicating torch.nn.RNN (tanh, 2 layers) + Linear."""
    (w_ih0, w_hh0, b_ih0, b_hh0, w_ih1, w_hh1, b_ih1, b_hh1, w_fc, b_fc) = raw
    B, T, _ = x.shape
    h0 = jnp.zeros((B, HIDDEN), jnp.float32)
    h1 = jnp.zeros((B, HIDDEN), jnp.float32)
    for t in range(T):
        xt = x[:, t, :]
        h0 = jnp.tanh(xt @ w_ih0.T + b_ih0 + h0 @ w_hh0.T + b_hh0)
        h1 = jnp.tanh(h0 @ w_ih1.T + b_ih1 + h1 @ w_hh1.T + b_hh1)
    return h1 @ w_fc.T + b_fc


if __name__ == "__main__":
    key = jax.random.PRNGKey(0)
    kx, kp = jax.random.split(key)
    B, T = 8, 8
    x = jax.random.normal(kx, (B, T, INPUT_SIZE), jnp.float32)

    params = init_params(kp)
    out = rnn_forward(x,
                      params["wih0p_t"], params["b01"], params["wrec_t"],
                      params["wfc_t"], params["bfc"])
    out = jax.block_until_ready(out)

    ref = reference_forward(x, params["raw"])
    assert out.shape == (B, NUM_CLASSES)
    # bf16 MXU operands vs f32 reference -> relaxed tolerance; the skewed fusion does not
    # change the rounding profile (re-validate at production sequence lengths).
    assert jnp.allclose(out, ref, atol=7.5e-2, rtol=5e-2), "mismatch vs reference"
    print("KERNEL_OK")
</pallas_src>

<mosaic_0001>
module attributes {stable_mosaic.version = 11 : i64} {
  func.func @rnn_kernel(%arg0: i32, %arg1: memref<64x64xf32, #tpu.memory_space<vmem>>, %arg2: memref<64x256xbf16, #tpu.memory_space<vmem>>, %arg3: memref<1x256xf32, #tpu.memory_space<vmem>>, %arg4: memref<256x256xbf16, #tpu.memory_space<vmem>>, %arg5: memref<128x128xbf16, #tpu.memory_space<vmem>>, %arg6: memref<1x128xf32, #tpu.memory_space<vmem>>, %arg7: memref<8x128xf32, #tpu.memory_space<vmem>>) attributes {dimension_semantics = [#tpu.dimension_semantics<parallel>], iteration_bounds = array<i64: 1>, scalar_prefetch = 0 : i64, scratch_operands = 0 : i64, tpu.core_type = #tpu.core_type<tc>, window_params = [{transform_indices = @transform_0, window_bounds = array<i64: 64, 64>}, {pipeline_mode = #tpu.pipeline_mode<synchronous>, transform_indices = @transform_1, window_bounds = array<i64: 64, 256>}, {pipeline_mode = #tpu.pipeline_mode<synchronous>, transform_indices = @transform_2, window_bounds = array<i64: 1, 256>}, {pipeline_mode = #tpu.pipeline_mode<synchronous>, transform_indices = @transform_3, window_bounds = array<i64: 256, 256>}, {pipeline_mode = #tpu.pipeline_mode<synchronous>, transform_indices = @transform_4, window_bounds = array<i64: 128, 128>}, {pipeline_mode = #tpu.pipeline_mode<synchronous>, transform_indices = @transform_5, window_bounds = array<i64: 1, 128>}, {transform_indices = @transform_6, window_bounds = array<i64: 8, 128>}]} {
    %c0 = arith.constant 0 : index
    %c0_0 = arith.constant 0 : index
    %0 = vector.load %arg1[%c0, %c0_0] : memref<64x64xf32, #tpu.memory_space<vmem>>, vector<64x64xf32>
    %1 = arith.truncf %0 : vector<64x64xf32> to vector<64x64xbf16>
    %c0_1 = arith.constant 0 : index
    %c0_2 = arith.constant 0 : index
    %2 = vector.load %arg2[%c0_1, %c0_2] : memref<64x256xbf16, #tpu.memory_space<vmem>>, vector<64x256xbf16>
    %cst = arith.constant dense<0.000000e+00> : vector<64x256xf32>
    %3 = tpu.matmul %1, %2, %cst {dimension_numbers = #tpu.dot_dimension_numbers<[1], [0], [0], [1], [0, 0, 1, 1], [], []>} : vector<64x64xbf16>, vector<64x256xbf16>, vector<64x256xf32> -> vector<64x256xf32>
    %c0_3 = arith.constant 0 : index
    %c0_4 = arith.constant 0 : index
    %4 = vector.load %arg3[%c0_3, %c0_4] : memref<1x256xf32, #tpu.memory_space<vmem>>, vector<1x256xf32>
    %5 = vector.broadcast %4 : vector<1x256xf32> to vector<64x256xf32>
    %6 = arith.addf %3, %5 : vector<64x256xf32>
    %7 = vector.shape_cast %6 : vector<64x256xf32> to vector<8x8x256xf32>
    %8 = vector.extract_strided_slice %7 {offsets = [0, 0, 0], sizes = [8, 1, 128], strides = [1, 1, 1]} : vector<8x8x256xf32> to vector<8x1x128xf32>
    %9 = vector.shape_cast %8 : vector<8x1x128xf32> to vector<8x128xf32>
    %10 = math.tanh %9 : vector<8x128xf32>
    %cst_5 = arith.constant 0.000000e+00 : f32
    %11 = vector.broadcast %cst_5 : f32 to vector<8x128xf32>
    %12 = tpu.concatenate %10, %11 in 1 : vector<8x128xf32>, vector<8x128xf32> -> vector<8x256xf32>
    %13 = arith.truncf %12 : vector<8x256xf32> to vector<8x256xbf16>
    %c0_6 = arith.constant 0 : index
    %c0_7 = arith.constant 0 : index
    %14 = vector.load %arg4[%c0_6, %c0_7] : memref<256x256xbf16, #tpu.memory_space<vmem>>, vector<256x256xbf16>
    %cst_8 = arith.constant dense<0.000000e+00> : vector<8x256xf32>
    %15 = tpu.matmul %13, %14, %cst_8 {dimension_numbers = #tpu.dot_dimension_numbers<[1], [0], [0], [1], [0, 0, 1, 1], [], []>} : vector<8x256xbf16>, vector<256x256xbf16>, vector<8x256xf32> -> vector<8x256xf32>
    %16 = vector.extract_strided_slice %7 {offsets = [0, 1, 0], sizes = [8, 1, 256], strides = [1, 1, 1]} : vector<8x8x256xf32> to vector<8x1x256xf32>
    %17 = vector.shape_cast %16 : vector<8x1x256xf32> to vector<8x256xf32>
    %18 = arith.addf %15, %17 : vector<8x256xf32>
    %19 = math.tanh %18 : vector<8x256xf32>
    %20 = arith.truncf %19 : vector<8x256xf32> to vector<8x256xbf16>
    %c0_9 = arith.constant 0 : index
    %c0_10 = arith.constant 0 : index
    %21 = vector.load %arg4[%c0_9, %c0_10] : memref<256x256xbf16, #tpu.memory_space<vmem>>, vector<256x256xbf16>
    %cst_11 = arith.constant dense<0.000000e+00> : vector<8x256xf32>
    %22 = tpu.matmul %20, %21, %cst_11 {dimension_numbers = #tpu.dot_dimension_numbers<[1], [0], [0], [1], [0, 0, 1, 1], [], []>} : vector<8x256xbf16>, vector<256x256xbf16>, vector<8x256xf32> -> vector<8x256xf32>
    %23 = vector.extract_strided_slice %7 {offsets = [0, 2, 0], sizes = [8, 1, 256], strides = [1, 1, 1]} : vector<8x8x256xf32> to vector<8x1x256xf32>
    %24 = vector.shape_cast %23 : vector<8x1x256xf32> to vector<8x256xf32>
    %25 = arith.addf %22, %24 : vector<8x256xf32>
    %26 = math.tanh %25 : vector<8x256xf32>
    %27 = arith.truncf %26 : vector<8x256xf32> to vector<8x256xbf16>
    %c0_12 = arith.constant 0 : index
    %c0_13 = arith.constant 0 : index
    %28 = vector.load %arg4[%c0_12, %c0_13] : memref<256x256xbf16, #tpu.memory_space<vmem>>, vector<256x256xbf16>
    %cst_14 = arith.constant dense<0.000000e+00> : vector<8x256xf32>
    %29 = tpu.matmul %27, %28, %cst_14 {dimension_numbers = #tpu.dot_dimension_numbers<[1], [0], [0], [1], [0, 0, 1, 1], [], []>} : vector<8x256xbf16>, vector<256x256xbf16>, vector<8x256xf32> -> vector<8x256xf32>
    %30 = vector.extract_strided_slice %7 {offsets = [0, 3, 0], sizes = [8, 1, 256], strides = [1, 1, 1]} : vector<8x8x256xf32> to vector<8x1x256xf32>
    %31 = vector.shape_cast %30 : vector<8x1x256xf32> to vector<8x256xf32>
    %32 = arith.addf %29, %31 : vector<8x256xf32>
    %33 = math.tanh %32 : vector<8x256xf32>
    %34 = arith.truncf %33 : vector<8x256xf32> to vector<8x256xbf16>
    %c0_15 = arith.constant 0 : index
    %c0_16 = arith.constant 0 : index
    %35 = vector.load %arg4[%c0_15, %c0_16] : memref<256x256xbf16, #tpu.memory_space<vmem>>, vector<256x256xbf16>
    %cst_17 = arith.constant dense<0.000000e+00> : vector<8x256xf32>
    %36 = tpu.matmul %34, %35, %cst_17 {dimension_numbers = #tpu.dot_dimension_numbers<[1], [0], [0], [1], [0, 0, 1, 1], [], []>} : vector<8x256xbf16>, vector<256x256xbf16>, vector<8x256xf32> -> vector<8x256xf32>
    %37 = vector.extract_strided_slice %7 {offsets = [0, 4, 0], sizes = [8, 1, 256], strides = [1, 1, 1]} : vector<8x8x256xf32> to vector<8x1x256xf32>
    %38 = vector.shape_cast %37 : vector<8x1x256xf32> to vector<8x256xf32>
    %39 = arith.addf %36, %38 : vector<8x256xf32>
    %40 = math.tanh %39 : vector<8x256xf32>
    %41 = arith.truncf %40 : vector<8x256xf32> to vector<8x256xbf16>
    %c0_18 = arith.constant 0 : index
    %c0_19 = arith.constant 0 : index
    %42 = vector.load %arg4[%c0_18, %c0_19] : memref<256x256xbf16, #tpu.memory_space<vmem>>, vector<256x256xbf16>
    %cst_20 = arith.constant dense<0.000000e+00> : vector<8x256xf32>
    %43 = tpu.matmul %41, %42, %cst_20 {dimension_numbers = #tpu.dot_dimension_numbers<[1], [0], [0], [1], [0, 0, 1, 1], [], []>} : vector<8x256xbf16>, vector<256x256xbf16>, vector<8x256xf32> -> vector<8x256xf32>
    %44 = vector.extract_strided_slice %7 {offsets = [0, 5, 0], sizes = [8, 1, 256], strides = [1, 1, 1]} : vector<8x8x256xf32> to vector<8x1x256xf32>
    %45 = vector.shape_cast %44 : vector<8x1x256xf32> to vector<8x256xf32>
    %46 = arith.addf %43, %45 : vector<8x256xf32>
    %47 = math.tanh %46 : vector<8x256xf32>
    %48 = arith.truncf %47 : vector<8x256xf32> to vector<8x256xbf16>
    %c0_21 = arith.constant 0 : index
    %c0_22 = arith.constant 0 : index
    %49 = vector.load %arg4[%c0_21, %c0_22] : memref<256x256xbf16, #tpu.memory_space<vmem>>, vector<256x256xbf16>
    %cst_23 = arith.constant dense<0.000000e+00> : vector<8x256xf32>
    %50 = tpu.matmul %48, %49, %cst_23 {dimension_numbers = #tpu.dot_dimension_numbers<[1], [0], [0], [1], [0, 0, 1, 1], [], []>} : vector<8x256xbf16>, vector<256x256xbf16>, vector<8x256xf32> -> vector<8x256xf32>
    %51 = vector.extract_strided_slice %7 {offsets = [0, 6, 0], sizes = [8, 1, 256], strides = [1, 1, 1]} : vector<8x8x256xf32> to vector<8x1x256xf32>
    %52 = vector.shape_cast %51 : vector<8x1x256xf32> to vector<8x256xf32>
    %53 = arith.addf %50, %52 : vector<8x256xf32>
    %54 = math.tanh %53 : vector<8x256xf32>
    %55 = arith.truncf %54 : vector<8x256xf32> to vector<8x256xbf16>
    %c0_24 = arith.constant 0 : index
    %c0_25 = arith.constant 0 : index
    %56 = vector.load %arg4[%c0_24, %c0_25] : memref<256x256xbf16, #tpu.memory_space<vmem>>, vector<256x256xbf16>
    %cst_26 = arith.constant dense<0.000000e+00> : vector<8x256xf32>
    %57 = tpu.matmul %55, %56, %cst_26 {dimension_numbers = #tpu.dot_dimension_numbers<[1], [0], [0], [1], [0, 0, 1, 1], [], []>} : vector<8x256xbf16>, vector<256x256xbf16>, vector<8x256xf32> -> vector<8x256xf32>
    %58 = vector.extract_strided_slice %7 {offsets = [0, 7, 0], sizes = [8, 1, 256], strides = [1, 1, 1]} : vector<8x8x256xf32> to vector<8x1x256xf32>
    %59 = vector.shape_cast %58 : vector<8x1x256xf32> to vector<8x256xf32>
    %60 = arith.addf %57, %59 : vector<8x256xf32>
    %61 = math.tanh %60 : vector<8x256xf32>
    %62 = arith.truncf %61 : vector<8x256xf32> to vector<8x256xbf16>
    %c0_27 = arith.constant 0 : index
    %c0_28 = arith.constant 0 : index
    %63 = vector.load %arg4[%c0_27, %c0_28] : memref<256x256xbf16, #tpu.memory_space<vmem>>, vector<256x256xbf16>
    %cst_29 = arith.constant dense<0.000000e+00> : vector<8x256xf32>
    %64 = tpu.matmul %62, %63, %cst_29 {dimension_numbers = #tpu.dot_dimension_numbers<[1], [0], [0], [1], [0, 0, 1, 1], [], []>} : vector<8x256xbf16>, vector<256x256xbf16>, vector<8x256xf32> -> vector<8x256xf32>
    %65 = vector.extract_strided_slice %64 {offsets = [0, 128], sizes = [8, 128], strides = [1, 1]} : vector<8x256xf32> to vector<8x128xf32>
    %c0_30 = arith.constant 0 : index
    %c128 = arith.constant 128 : index
    %66 = vector.load %arg3[%c0_30, %c128] : memref<1x256xf32, #tpu.memory_space<vmem>>, vector<1x128xf32>
    %67 = vector.broadcast %66 : vector<1x128xf32> to vector<8x128xf32>
    %68 = arith.addf %65, %67 : vector<8x128xf32>
    %69 = math.tanh %68 : vector<8x128xf32>
    %70 = arith.truncf %69 : vector<8x128xf32> to vector<8x128xbf16>
    %c0_31 = arith.constant 0 : index
    %c0_32 = arith.constant 0 : index
    %71 = vector.load %arg5[%c0_31, %c0_32] : memref<128x128xbf16, #tpu.memory_space<vmem>>, vector<128x128xbf16>
    %cst_33 = arith.constant dense<0.000000e+00> : vector<8x128xf32>
    %72 = tpu.matmul %70, %71, %cst_33 {dimension_numbers = #tpu.dot_dimension_numbers<[1], [0], [0], [1], [0, 0, 1, 1], [], []>} : vector<8x128xbf16>, vector<128x128xbf16>, vector<8x128xf32> -> vector<8x128xf32>
    %c0_34 = arith.constant 0 : index
    %c0_35 = arith.constant 0 : index
    %73 = vector.load %arg6[%c0_34, %c0_35] : memref<1x128xf32, #tpu.memory_space<vmem>>, vector<1x128xf32>
    %74 = vector.broadcast %73 : vector<1x128xf32> to vector<8x128xf32>
    %75 = arith.addf %72, %74 : vector<8x128xf32>
    %c0_36 = arith.constant 0 : index
    %c0_37 = arith.constant 0 : index
    %76 = vector.load %arg7[%c0_36, %c0_37] : memref<8x128xf32, #tpu.memory_space<vmem>>, vector<8x128xf32>
    tpu.vector_store %arg7[%c0_36, %c0_37], %75 {strides = array<i32>} : memref<8x128xf32, #tpu.memory_space<vmem>>, vector<8x128xf32>,
    return
  }
  func.func @transform_0(%arg0: i32) -> (i32, i32) {
    %c0_i32 = arith.constant 0 : i32
    %c0_i32_0 = arith.constant 0 : i32
    return %arg0, %c0_i32 : i32, i32
  }
  func.func @transform_1(%arg0: i32) -> (i32, i32) {
    %c0_i32 = arith.constant 0 : i32
    %c0_i32_0 = arith.constant 0 : i32
    %c0_i32_1 = arith.constant 0 : i32
    return %c0_i32, %c0_i32_0 : i32, i32
  }
  func.func @transform_2(%arg0: i32) -> (i32, i32) {
    %c0_i32 = arith.constant 0 : i32
    %c0_i32_0 = arith.constant 0 : i32
    %c0_i32_1 = arith.constant 0 : i32
    return %c0_i32, %c0_i32_0 : i32, i32
  }
  func.func @transform_3(%arg0: i32) -> (i32, i32) {
    %c0_i32 = arith.constant 0 : i32
    %c0_i32_0 = arith.constant 0 : i32
    %c0_i32_1 = arith.constant 0 : i32
    return %c0_i32, %c0_i32_0 : i32, i32
  }
  func.func @transform_4(%arg0: i32) -> (i32, i32) {
    %c0_i32 = arith.constant 0 : i32
    %c0_i32_0 = arith.constant 0 : i32
    %c0_i32_1 = arith.constant 0 : i32
    return %c0_i32, %c0_i32_0 : i32, i32
  }
  func.func @transform_5(%arg0: i32) -> (i32, i32) {
    %c0_i32 = arith.constant 0 : i32
    %c0_i32_0 = arith.constant 0 : i32
    %c0_i32_1 = arith.constant 0 : i32
    return %c0_i32, %c0_i32_0 : i32, i32
  }
  func.func @transform_6(%arg0: i32) -> (i32, i32) {
    %c0_i32 = arith.constant 0 : i32
    %c0_i32_0 = arith.constant 0 : i32
    return %arg0, %c0_i32 : i32, i32
  }
}

</mosaic_0001>

<bundles_post_ra>
// kernel: rnn_forward_padded.1
= control target key start
LH: loop header
LB: loop body
LE: loop exit
PB: predicated region body
PF: predicated region fallthrough
CT: control target
= control target key end

     0   :  { %11 = vsyncpa [#allocation3], 0  ;;  %s2333_s0 = inlined_call_operand.hbm [shape: f32[64,64], index: 0, kind: input, shape index: {}]   ;;  %s2334_s1 = inlined_call_operand.hbm [shape: bf16[64,256], index: 1, kind: input, shape index: {}]   ;;  %s2335_s2 = inlined_call_operand.vmem [shape: f32[1,256], index: 2, kind: input, shape index: {}]   ;;  %s2336_s3 = inlined_call_operand.hbm [shape: bf16[256,256], index: 3, kind: input, shape index: {}]   ;;  %s2337_s4 = inlined_call_operand.hbm [shape: bf16[128,128], index: 4, kind: input, shape index: {}]   ;;  %s2338_s5 = inlined_call_operand.vmem [shape: f32[1,128], index: 5, kind: input, shape index: {}]   ;;  %s2339_s6 = inlined_call_operand.hbm [shape: f32[8,128], index: 6, kind: output, shape index: {}]  }
   0x1   :  { %12 = vsyncpa [#allocation6], 0 }
   0x2   :  { %13 = vsyncpa [#allocation9], 0 }
   0x3   :  { %14 = vsyncpa [#allocation4], 0  ;;  %s1550_s21 = smov [#allocation5]   ;;  %s1551_s23 = smov [#allocation2]  }
   0x4   :  { %s32_s22 = sshll.u32 %s1550_s21, 4  ;;  %s20_s24 = sshll.u32 %s1551_s23, 4  ;;  %s33_s22 = int_to_ptr.vmem [resolvable:$true] %s32_s22  ;;  %s1598_s24 = int_to_ptr.vmem [resolvable:$true] %s20_s24 }
   0x5   :  { %s1432_s27 = scalar_lea.hbm %s2334_s1, 1024 }
   0x6   :  { %p1433_p0 = scmp.ne.s32.totalorder %s2334_s1, %s1432_s27  ;;  %p1436_p1 = scmp.lt.u32.totalorder %s1432_s27, %s2334_s1 }
   0x8   :  { %p1438_p2 = pnand %p1436_p1, %p1433_p0 }
   0xa   :  { %1441 = shalt.err (!%p1438_p2)
}
   0xb   :  { %s1442_s8 = scalar_lea.vmem %s33_s22, 1024  ;;  %p1447_p4 = scmp.lt.s32.totalorder %s33_s22, %s33_s22 }
   0xc   :  { %p1443_p3 = scmp.ne.s32.totalorder %s33_s22, %s1442_s8  ;;  %p1448_p5 = scmp.lt.s32.totalorder %s1442_s8, %s1442_s8 }
   0xe   :  { %p1449_p6 = por %p1448_p5, %p1447_p4 }
  0x10   :  { %p1450_p7 = pnand %p1449_p6, %p1443_p3 }
  0x12   :  { %1453 = shalt.err (!%p1450_p7)
}
  0x13   :  { %s1552_s9 = smov 128   ;;  %s1553_s10 = smov 8  }
  0x14   :  { %38 = dma.hbm_to_vmem [thread:$0]  %s2334_s1, 1024, %s33_s22, [#allocation6], %s1552_s9, %s1552_s9, %s1553_s10  }
  0x15   :  { %s1454_s15 = scalar_lea.hbm %s2333_s0, 1024 }
  0x16   :  { %p1455_p8 = scmp.ne.s32.totalorder %s2333_s0, %s1454_s15  ;;  %p1458_p9 = scmp.lt.u32.totalorder %s1454_s15, %s2333_s0 }
  0x18   :  { %p1460_p10 = pnand %p1458_p9, %p1455_p8 }
  0x1a   :  { %1463 = shalt.err (!%p1460_p10)
}
  0x1b   :  { %s1464_s20 = scalar_lea.vmem %s1598_s24, 1024  ;;  %p1469_p12 = scmp.lt.s32.totalorder %s1598_s24, %s1598_s24 }
  0x1c   :  { %p1465_p11 = scmp.ne.s32.totalorder %s1598_s24, %s1464_s20  ;;  %p1470_p13 = scmp.lt.s32.totalorder %s1464_s20, %s1464_s20 }
  0x1e   :  { %p1471_p0 = por %p1470_p13, %p1469_p12 }
  0x20   :  { %p1472_p1 = pnand %p1471_p0, %p1465_p11 }
  0x22   :  { %1475 = shalt.err (!%p1472_p1)
}
  0x23   :  { %26 = dma.hbm_to_vmem [thread:$0]  %s2333_s0, 1024, %s1598_s24, [#allocation3], %s1552_s9, %s1552_s9, %s1553_s10  }
  0x24   :  { %s1554_s22 = smov [#allocation7]   ;;  %s1555_s25 = smov [#allocation8]  }
  0x25   :  { %s46_s23 = sshll.u32 %s1554_s22, 4  ;;  %s58_s26 = sshll.u32 %s1555_s25, 4  ;;  %s47_s23 = int_to_ptr.vmem [resolvable:$true] %s46_s23  ;;  %s1635_s26 = int_to_ptr.vmem [resolvable:$true] %s58_s26 }
  0x26   :  { %s1476_s29 = scalar_lea.hbm %s2336_s3, 4096 }
  0x27   :  { %p1477_p2 = scmp.ne.s32.totalorder %s2336_s3, %s1476_s29  ;;  %p1480_p3 = scmp.lt.u32.totalorder %s1476_s29, %s2336_s3 }
  0x29   :  { %p1482_p4 = pnand %p1480_p3, %p1477_p2 }
  0x2b   :  { %1485 = shalt.err (!%p1482_p4)
}
  0x2c   :  { %s1486_s0 = scalar_lea.vmem %s47_s23, 4096  ;;  %p1491_p6 = scmp.lt.s32.totalorder %s47_s23, %s47_s23 }
  0x2d   :  { %p1487_p5 = scmp.ne.s32.totalorder %s47_s23, %s1486_s0  ;;  %p1492_p7 = scmp.lt.s32.totalorder %s1486_s0, %s1486_s0 }
  0x2f   :  { %p1493_p8 = por %p1492_p7, %p1491_p6 }
  0x31   :  { %p1494_p9 = pnand %p1493_p8, %p1487_p5 }
  0x33   :  { %1497 = shalt.err (!%p1494_p9)
}
  0x34   :  { %52 = dma.hbm_to_vmem [thread:$0]  %s2336_s3, 4096, %s47_s23, [#allocation6], %s1552_s9, %s1552_s9, %s1553_s10  }
  0x35   :  { %s1498_s15 = scalar_lea.hbm %s2337_s4, 1024 }
  0x36   :  { %p1499_p10 = scmp.ne.s32.totalorder %s2337_s4, %s1498_s15  ;;  %p1502_p11 = scmp.lt.u32.totalorder %s1498_s15, %s2337_s4 }
  0x38   :  { %p1504_p12 = pnand %p1502_p11, %p1499_p10 }
  0x3a   :  { %1507 = shalt.err (!%p1504_p12)
}
  0x3b   :  { %s1508_s20 = scalar_lea.vmem %s1635_s26, 1024  ;;  %p1513_p0 = scmp.lt.s32.totalorder %s1635_s26, %s1635_s26 }
  0x3c   :  { %p1509_p13 = scmp.ne.s32.totalorder %s1635_s26, %s1508_s20  ;;  %p1514_p1 = scmp.lt.s32.totalorder %s1508_s20, %s1508_s20 }
  0x3e   :  { %p1515_p2 = por %p1514_p1, %p1513_p0 }
  0x40   :  { %p1516_p3 = pnand %p1515_p2, %p1509_p13 }
  0x42   :  { %1519 = shalt.err (!%p1516_p3)
}
  0x43   :  { %s1556_s3 = smov 64   ;;  %s1557_s9 = smov 4  }
  0x44   :  { %64 = dma.hbm_to_vmem [thread:$0]  %s2337_s4, 1024, %s1635_s26, [#allocation9], %s1556_s3, %s1556_s3, %s1557_s9  }
  0x45   :  { %1542 = dma.done.wait [#allocation3], 1024  }
  0x46   :  { %1543 = vsyncadd [#allocation3], 4294966272 }
  0x47   :  { %1544 = dma.done.wait [#allocation6], 5120  }
  0x48   :  { %1545 = vsyncadd [#allocation6], 4294962176 }
  0x49   :  { %1546 = dma.done.wait [#allocation9], 1024  }
  0x4a   :  { %1547 = vsyncadd [#allocation9], 4294966272  ;;  %v1558_v0 = vmov 0   ;;  %v1286_v1 = vld [vmem:[#allocation5 + $0x4] ss:$8 sps:$4 sm:$0xff]   ;;  %vm152_vm0 = vcmask 523264   ;;  %v102_v54 = vlaneseq }
  0x4b   :  { %197 = vmatprep.mubr.bf16.mxu0 %v1558_v0  ;;  %v1288_v2 = vld [vmem:[#allocation5] ss:$8 sps:$4 sm:$0xff]   ;;  %165 = vmatprep.subr.bf16.mxu0 %v1286_v1  ;;  %v1289_v3 = vld [vmem:[#allocation5 + $0x14] ss:$8 sps:$4 sm:$0xff]   ;;  %v1291_v4 = vld [vmem:[#allocation5 + $0x10] ss:$8 sps:$4 sm:$0xff]  }
  0x4c   :  { %166 = vmatpush1.bf16.msra.mxu0 %v1288_v2  ;;  %v1292_v5 = vld [vmem:[#allocation5 + $0x24] ss:$8 sps:$4 sm:$0xff]   ;;  %v1294_v6 = vld [vmem:[#allocation5 + $0x20] ss:$8 sps:$4 sm:$0xff]   ;;  %v1295_v7 = vld [vmem:[#allocation5 + $0x34] ss:$8 sps:$4 sm:$0xff]  }
  0x4d   :  { %167 = vmatprep.subr.bf16.mxu0 %v1289_v3  ;;  %v1669_v8 = vld [vmem:[#allocation7 + $0x4] ss:$8 sps:$4 sm:$0xff]   ;;  %v1297_v9 = vld [vmem:[#allocation5 + $0x30] ss:$8 sps:$4 sm:$0xff]   ;;  %v1671_v10 = vld [vmem:[#allocation7] ss:$8 sps:$4 sm:$0xff]  }
  0x4e   :  { %2361 = vst [vmem:[#allocation15_spill] sm:$0xff] %v1669_v8  ;;  %v80_v11 = vld [vmem:[#allocation2] sm:$0xff]  ;;  %516 = vmatprep.subr.bf16.mxu1 %v1669_v8  ;;  %v1674_v12 = vld [vmem:[#allocation7 + $0x14] ss:$8 sps:$4 sm:$0xff]   ;;  %v81_v13 = vld [vmem:[#allocation2 + $0x8] sm:$0xff]  ;;  %v1559_v50 = vmov 0.0|0.0  }
  0x4f   :  { %517 = vmatpush1.bf16.msra.mxu1 %v1671_v10  ;;  %v1677_v14 = vld [vmem:[#allocation7 + $0x10] ss:$8 sps:$4 sm:$0xff]   ;;  %v1680_v15 = vld [vmem:[#allocation7 + $0x24] ss:$8 sps:$4 sm:$0xff]   ;;  %v88_v16 = vpack.c.bf16 %v81_v13, %v80_v11  ;;  %v1682_v17 = vld [vmem:[#allocation7 + $0x20] ss:$8 sps:$4 sm:$0xff]   ;;  %548 = vmatprep.mubr.bf16.mxu1 %v1559_v50 }
  0x50   :  { %168 = vmatpush1.bf16.msra.mxu0 %v1291_v4  ;;  %518 = vmatprep.subr.bf16.mxu1 %v1674_v12  ;;  %v1684_v18 = vld [vmem:[#allocation7 + $0x34] ss:$8 sps:$4 sm:$0xff]   ;;  %v1689_v21 = vld [vmem:[#allocation7 + $0x30] ss:$8 sps:$4 sm:$0xff]   ;;  %v1692_v22 = vld [vmem:[#allocation7 + $0x44] ss:$8 sps:$4 sm:$0xff]  }
  0x51   :  { %169 = vmatprep.subr.bf16.mxu0 %v1292_v5  ;;  %v82_v19 = vld [vmem:[#allocation2 + $0x10] sm:$0xff]  ;;  %v83_v20 = vld [vmem:[#allocation2 + $0x18] sm:$0xff]  ;;  %v1697_v23 = vld [vmem:[#allocation7 + $0x40] ss:$8 sps:$4 sm:$0xff]   ;;  %v103_v55 = vshrl.u32 %v102_v54, 7  ;;  %vm255_vm1 = vcmask 1041409  }
  0x52   :  { %v89_v24 = vpack.c.bf16 %v83_v20, %v82_v19  ;;  %v84_v25 = vld [vmem:[#allocation2 + $0x20] sm:$0xff]  ;;  %v85_v26 = vld [vmem:[#allocation2 + $0x28] sm:$0xff]  ;;  %v86_v28 = vld [vmem:[#allocation2 + $0x30] sm:$0xff]  ;;  %vm258_vm2 = vcmask 1042434   ;;  %vm261_vm3 = vcmask 1043459   ;;  %vm264_vm4 = vcmask 1044484  }
  0x53   :  { %519 = vmatpush1.bf16.msra.mxu1 %v1677_v14  ;;  %v90_v27 = vpack.c.bf16 %v85_v26, %v84_v25  ;;  %v87_v29 = vld [vmem:[#allocation2 + $0x38] sm:$0xff]  ;;  %v1721_v33 = vld [vmem:[#allocation7 + $0x64] ss:$8 sps:$4 sm:$0xff]   ;;  %v1723_v34 = vld [vmem:[#allocation7 + $0x60] ss:$8 sps:$4 sm:$0xff]   ;;  %v104_v56 = vsub.s32 0, %v103_v55 }
  0x54   :  { %170 = vmatpush1.bf16.msra.mxu0 %v1294_v6  ;;  %520 = vmatprep.subr.bf16.mxu1 %v1680_v15  ;;  %v91_v30 = vpack.c.bf16 %v87_v29, %v86_v28  ;;  %v1713_v31 = vld [vmem:[#allocation7 + $0x54] ss:$8 sps:$4 sm:$0xff]   ;;  %v1715_v32 = vld [vmem:[#allocation7 + $0x50] ss:$8 sps:$4 sm:$0xff]   ;;  %v1737_v37 = vld [vmem:[#allocation7 + $0x84] ss:$8 sps:$4 sm:$0xff]  }
  0x55   :  { %171 = vmatprep.subr.bf16.mxu0 %v1295_v7  ;;  %v1729_v35 = vld [vmem:[#allocation7 + $0x74] ss:$8 sps:$4 sm:$0xff]   ;;  %v1731_v36 = vld [vmem:[#allocation7 + $0x70] ss:$8 sps:$4 sm:$0xff]   ;;  %v1739_v38 = vld [vmem:[#allocation7 + $0x80] ss:$8 sps:$4 sm:$0xff]  }
  0x56   :  { %v1745_v39 = vld [vmem:[#allocation7 + $0x94] ss:$8 sps:$4 sm:$0xff]   ;;  %v1747_v40 = vld [vmem:[#allocation7 + $0x90] ss:$8 sps:$4 sm:$0xff]   ;;  %v1753_v41 = vld [vmem:[#allocation7 + $0xa4] ss:$8 sps:$4 sm:$0xff]  }
  0x57   :  { %521 = vmatpush1.bf16.msra.mxu1 %v1682_v17  ;;  %v1755_v42 = vld [vmem:[#allocation7 + $0xa0] ss:$8 sps:$4 sm:$0xff]   ;;  %v1761_v43 = vld [vmem:[#allocation7 + $0xb4] ss:$8 sps:$4 sm:$0xff]   ;;  %v1763_v44 = vld [vmem:[#allocation7 + $0xb0] ss:$8 sps:$4 sm:$0xff]  }
  0x58   :  { %172 = vmatpush1.bf16.msra.mxu0 %v1297_v9  ;;  %522 = vmatprep.subr.bf16.mxu1 %v1684_v18  ;;  %2362 = vst [vmem:[#allocation16_spill] sm:$0xff] %v1761_v43  ;;  %2363 = vst [vmem:[#allocation17_spill] sm:$0xff] %v1763_v44  ;;  %v1769_v45 = vld [vmem:[#allocation7 + $0xc4] ss:$8 sps:$4 sm:$0xff]   ;;  %v1771_v46 = vld [vmem:[#allocation7 + $0xc0] ss:$8 sps:$4 sm:$0xff]  }
  0x59   :  { %591 = vmatprep.subr.bf16.mxu0 %v1669_v8  ;;  %2364 = vst [vmem:[#allocation18_spill] sm:$0xff] %v1769_v45  ;;  %2365 = vst [vmem:[#allocation19_spill] sm:$0xff] %v1771_v46  ;;  %v1773_v47 = vld [vmem:[#allocation7 + $0xd4] ss:$8 sps:$4 sm:$0xff]   ;;  %v1778_v48 = vld [vmem:[#allocation7 + $0xd0] ss:$8 sps:$4 sm:$0xff]  }
  0x5a   :  { %2366 = vst [vmem:[#allocation20_spill] sm:$0xff] %v1773_v47  ;;  %2367 = vst [vmem:[#allocation21_spill] sm:$0xff] %v1778_v48  ;;  %v1782_v49 = vld [vmem:[#allocation7 + $0xe4] ss:$8 sps:$4 sm:$0xff]   ;;  %v1786_v51 = vld [vmem:[#allocation7 + $0xe0] ss:$8 sps:$4 sm:$0xff]  }
  0x5b   :  { %1198 = vmatmul.mubr.msk.bf16.vlgmr.msra.gmra.mrb[0].mxu0 %vm152_vm0, %v88_v16  ;;  %523 = vmatpush1.bf16.msra.mxu1 %v1689_v21  ;;  %2368 = vst [vmem:[#allocation22_spill] sm:$0xff] %v1782_v49  ;;  %2369 = vst [vmem:[#allocation23_spill] sm:$0xff] %v1786_v51  ;;  %v1790_v52 = vld [vmem:[#allocation7 + $0xf4] ss:$8 sps:$4 sm:$0xff]   ;;  %v1794_v53 = vld [vmem:[#allocation7 + $0xf0] ss:$8 sps:$4 sm:$0xff]  }
  0x5c   :  { %207 = vmatprep.mubr.bf16.mxu0 %v1558_v0  ;;  %592 = vmatpush1.bf16.msra.mxu0 %v1671_v10  ;;  %2370 = vst [vmem:[#allocation24_spill] sm:$0xff] %v1790_v52  ;;  %2371 = vst [vmem:[#allocation25_spill] sm:$0xff] %v1794_v53  ;;  %v100_v57 = vld [vmem:[%s2335_s2] sm:$0x3]  ;;  %v108_v58 = vsub.s32 1, %v103_v55  ;;  %vm267_vm5 = vcmask 1045509  }
  0x5d   :  { %593 = vmatprep.subr.bf16.mxu0 %v1674_v12  ;;  %524 = vmatprep.subr.bf16.mxu1 %v1692_v22  ;;  %v1806_v59 = vrot.slane %v100_v57, %v104_v56  ;;  %vm270_vm6 = vcmask 1046534   ;;  %vm273_vm7 = vcmask 1047559   ;;  %vm1561_vm8 = vmmov 0   ;;  %s1562_s27 = smov [#allocation10]  }
  0x5e   :  { %v1808_v60 = vrot.slane %v100_v57, %v108_v58  ;;  %s1179_s28 = sshll.u32 %s1562_s27, 4  ;;  %s1180_s28 = int_to_ptr.vmem [resolvable:$true] %s1179_s28 }
  0x5f   :  { %525 = vmatpush1.bf16.msra.mxu1 %v1697_v23  ;;  %p1525_p5 = scmp.lt.s32.totalorder %s1180_s28, %s1180_s28 }
  0x60   :  { %594 = vmatpush1.bf16.msra.mxu0 %v1677_v14  ;;  %526 = vmatprep.subr.bf16.mxu1 %v1713_v31 }
  0x61   :  { %595 = vmatprep.subr.bf16.mxu0 %v1680_v15 }
  0x63   :  { %1199 = vmatmul.mubr.msk.bf16.gmra.mrb[4].mxu0 %vm152_vm0, %v89_v24  ;;  %527 = vmatpush1.bf16.msra.mxu1 %v1715_v32 }
  0x64   :  { %217 = vmatprep.mubr.bf16.mxu0 %v1558_v0  ;;  %596 = vmatpush1.bf16.msra.mxu0 %v1682_v17 }
  0x65   :  { %597 = vmatprep.subr.bf16.mxu0 %v1684_v18  ;;  %528 = vmatprep.subr.bf16.mxu1 %v1721_v33 }
  0x67   :  { %529 = vmatpush1.bf16.msra.mxu1 %v1723_v34 }
  0x68   :  { %598 = vmatpush1.bf16.msra.mxu0 %v1689_v21  ;;  %530 = vmatprep.subr.bf16.mxu1 %v1729_v35 }
  0x69   :  { %599 = vmatprep.subr.bf16.mxu0 %v1692_v22 }
  0x6b   :  { %1200 = vmatmul.mubr.msk.bf16.gmra.mrb[8].mxu0 %vm152_vm0, %v90_v27  ;;  %531 = vmatpush1.bf16.msra.mxu1 %v1731_v36 }
  0x6c   :  { %227 = vmatprep.mubr.bf16.mxu0 %v1558_v0  ;;  %600 = vmatpush1.bf16.msra.mxu0 %v1697_v23 }
  0x6d   :  { %601 = vmatprep.subr.bf16.mxu0 %v1713_v31  ;;  %532 = vmatprep.subr.bf16.mxu1 %v1737_v37 }
  0x6f   :  { %533 = vmatpush1.bf16.msra.mxu1 %v1739_v38 }
  0x70   :  { %602 = vmatpush1.bf16.msra.mxu0 %v1715_v32  ;;  %534 = vmatprep.subr.bf16.mxu1 %v1745_v39 }
  0x71   :  { %603 = vmatprep.subr.bf16.mxu0 %v1721_v33 }
  0x73   :  { %1201 = vmatmul.mubr.msk.bf16.gmra.mrb[12].mxu0 %vm152_vm0, %v91_v30  ;;  %535 = vmatpush1.bf16.msra.mxu1 %v1747_v40 }
  0x74   :  { %604 = vmatpush1.bf16.msra.mxu0 %v1723_v34  ;;  %536 = vmatprep.subr.bf16.mxu1 %v1753_v41 }
  0x75   :  { %605 = vmatprep.subr.bf16.mxu0 %v1729_v35 }
  0x77   :  { %537 = vmatpush1.bf16.msra.mxu1 %v1755_v42 }
  0x78   :  { %606 = vmatpush1.bf16.msra.mxu0 %v1731_v36  ;;  %538 = vmatprep.subr.bf16.mxu1 %v1761_v43 }
  0x79   :  { %607 = vmatprep.subr.bf16.mxu0 %v1737_v37 }
  0x7b   :  { %539 = vmatpush1.bf16.msra.mxu1 %v1763_v44 }
  0x7c   :  { %608 = vmatpush1.bf16.msra.mxu0 %v1739_v38  ;;  %540 = vmatprep.subr.bf16.mxu1 %v1769_v45 }
  0x7d   :  { %609 = vmatprep.subr.bf16.mxu0 %v1745_v39 }
  0x7f   :  { %541 = vmatpush1.bf16.msra.mxu1 %v1771_v46 }
  0x80   :  { %610 = vmatpush1.bf16.msra.mxu0 %v1747_v40  ;;  %542 = vmatprep.subr.bf16.mxu1 %v1773_v47 }
  0x81   :  { %611 = vmatprep.subr.bf16.mxu0 %v1753_v41 }
  0x83   :  { %543 = vmatpush1.bf16.msra.mxu1 %v1778_v48 }
  0x84   :  { %612 = vmatpush1.bf16.msra.mxu0 %v1755_v42  ;;  %544 = vmatprep.subr.bf16.mxu1 %v1782_v49 }
  0x85   :  { %613 = vmatprep.subr.bf16.mxu0 %v1761_v43 }
  0x87   :  { %545 = vmatpush1.bf16.msra.mxu1 %v1786_v51 }
  0x88   :  { %614 = vmatpush1.bf16.msra.mxu0 %v1763_v44  ;;  %546 = vmatprep.subr.bf16.mxu1 %v1790_v52 }
  0x89   :  { %615 = vmatprep.subr.bf16.mxu0 %v1769_v45 }
  0x8b   :  { %547 = vmatpush1.bf16.msra.mxu1 %v1794_v53 }
  0x8c   :  { %616 = vmatpush1.bf16.msra.mxu0 %v1771_v46  ;;  %666 = vmatprep.subr.bf16.mxu1 %v1669_v8 }
  0x8d   :  { %617 = vmatprep.subr.bf16.mxu0 %v1773_v47 }
  0x90   :  { %618 = vmatpush1.bf16.msra.mxu0 %v1778_v48 }
  0x91   :  { %619 = vmatprep.subr.bf16.mxu0 %v1782_v49 }
  0x94   :  { %620 = vmatpush1.bf16.msra.mxu0 %v1786_v51 }
  0x95   :  { %621 = vmatprep.subr.bf16.mxu0 %v1790_v52 }
  0x98   :  { %622 = vmatpush1.bf16.msra.mxu0 %v1794_v53 }
  0x99   :  { %741 = vmatprep.subr.bf16.mxu0 %v1669_v8 }
 0x12e   :  { %v199_v61 = vpop.f32.mrb[0].mxu0 }
 0x12f   :  { %v1811_v62 = vadd.f32 %v199_v61, %v1806_v59  ;;  %v201_v63 = vpop.f32.mrb[1].mxu0 }
 0x130   :  { %v1814_v0 = vadd.f32 %v201_v63, %v1808_v60  ;;  %v203_v1 = vpop.f32.mrb[2].mxu0 }
 0x131   :  { %1354 = vtanh.f32 %v1811_v62  ;;  %v1818_v2 = vadd.f32 %v203_v1, %v1806_v59  ;;  %v205_v3 = vpop.f32.mrb[3].mxu0  ;;  %v486_v4 = vrot.slane %v1811_v62, 1  ;;  %v561_v5 = vrot.slane %v1811_v62, 2 }
 0x132   :  { %v1823_v6 = vadd.f32 %v205_v3, %v1808_v60  ;;  %v500_v7 = vrot.slane %v1814_v0, 1  ;;  %v575_v9 = vrot.slane %v1814_v0, 2  ;;  %v636_v11 = vrot.slane %v1811_v62, 3 }
 0x133   :  { %1356 = vtanh.f32 %v1818_v2  ;;  %v487_v13 = vsel %vm255_vm1, %v1818_v2, %v486_v4  ;;  %v562_v16 = vrot.slane %v1818_v2, 1  ;;  %v637_v19 = vrot.slane %v1818_v2, 2 }
 0x134   :  { %v501_v20 = vsel %vm255_vm1, %v1823_v6, %v500_v7  ;;  %v576_v24 = vrot.slane %v1823_v6, 1  ;;  %v650_v25 = vrot.slane %v1814_v0, 3  ;;  %v651_v26 = vrot.slane %v1823_v6, 2 }
 0x135   :  { %v563_v27 = vsel %vm255_vm1, %v562_v16, %v561_v5  ;;  %v638_v28 = vsel %vm255_vm1, %v637_v19, %v636_v11  ;;  %v711_v29 = vrot.slane %v1811_v62, 4  ;;  %v712_v30 = vrot.slane %v1818_v2, 3 }
 0x136   :  { %v209_v50 = vpop.f32.mrb[4].mxu0  ;;  %v577_v54 = vsel %vm255_vm1, %v576_v24, %v575_v9  ;;  %v652_v55 = vsel %vm255_vm1, %v651_v26, %v650_v25  ;;  %v725_v56 = vrot.slane %v1814_v0, 4  ;;  %v726_v57 = vrot.slane %v1823_v6, 3 }
 0x137   :  { %v1847_v58 = vadd.f32 %v209_v50, %v1806_v59  ;;  %v211_v61 = vpop.f32.mrb[5].mxu0  ;;  %v713_v63 = vsel %vm255_vm1, %v712_v30, %v711_v29 }
 0x138   :  { %v1853_v4 = vadd.f32 %v211_v61, %v1808_v60  ;;  %v213_v5 = vpop.f32.mrb[6].mxu0  ;;  %v1856_v7 = vsel %vm255_vm1, %v726_v57, %v725_v56 }
 0x139   :  { %v1861_v16 = vadd.f32 %v213_v5, %v1806_v59  ;;  %v215_v19 = vpop.f32.mrb[7].mxu0  ;;  %1358 = vtanh.f32 %v1847_v58  ;;  %v488_v24 = vrot.slane %v1847_v58, 7  ;;  %v564_v25 = vsel %vm258_vm2, %v1847_v58, %v563_v27 }
 0x13a   :  { %v1868_v26 = vadd.f32 %v215_v19, %v1808_v60  ;;  %v502_v29 = vrot.slane %v1853_v4, 7  ;;  %v578_v30 = vsel %vm258_vm2, %v1853_v4, %v577_v54  ;;  %v639_v50 = vrot.slane %v1847_v58, 1 }
 0x13b   :  { %v1355_v56 = vpop.eup %1354  ;;  %1360 = vtanh.f32 %v1861_v16  ;;  %v489_v57 = vsel %vm258_vm2, %v488_v24, %v487_v13  ;;  %v490_v61 = vrot.slane %v1861_v16, 6  ;;  %v565_v27 = vrot.slane %v1861_v16, 7 }
 0x13c   :  { %v503_v5 = vsel %vm258_vm2, %v502_v29, %v501_v20  ;;  %v504_v19 = vrot.slane %v1868_v26, 6  ;;  %v579_v11 = vrot.slane %v1868_v26, 7  ;;  %v640_v9 = vsel %vm258_vm2, %v639_v50, %v638_v28 }
 0x13d   :  { %v1357_v54 = vpop.eup %1356  ;;  %v491_v3 = vsel %vm261_vm3, %v490_v61, %v489_v57  ;;  %v566_v1 = vsel %vm261_vm3, %v565_v27, %v564_v25  ;;  %v641_v13 = vsel %vm261_vm3, %v1861_v16, %v640_v9  ;;  %v653_v24 = vrot.slane %v1853_v4, 1 }
 0x13e   :  { %v219_v8 = vpop.f32.mrb[8].mxu0  ;;  %v254_v53 = vrot.slane %v1357_v54, 7  ;;  %v505_v20 = vsel %vm261_vm3, %v504_v19, %v503_v5  ;;  %v580_v29 = vsel %vm261_vm3, %v579_v11, %v578_v30  ;;  %v714_v52 = vrot.slane %v1847_v58, 2 }
 0x13f   :  { %v1891_v28 = vadd.f32 %v219_v8, %v1806_v59  ;;  %v221_v50 = vpop.f32.mrb[9].mxu0  ;;  %v654_v57 = vsel %vm258_vm2, %v653_v24, %v652_v55  ;;  %v716_v25 = vrot.slane %v1861_v16, 1 }
 0x140   :  { %v1897_v61 = vadd.f32 %v221_v50, %v1808_v60  ;;  %v223_v27 = vpop.f32.mrb[10].mxu0  ;;  %v256_v5 = vsel %vm255_vm1, %v254_v53, %v1355_v56  ;;  %v1902_v11 = vsel %vm261_vm3, %v1868_v26, %v654_v57  ;;  %v715_v8 = vsel %vm258_vm2, %v714_v52, %v713_v63 }
 0x141   :  { %v1906_v30 = vadd.f32 %v223_v27, %v1806_v59  ;;  %v225_v55 = vpop.f32.mrb[11].mxu0  ;;  %1362 = vtanh.f32 %v1891_v28  ;;  %v492_v19 = vrot.slane %v1891_v28, 5  ;;  %v567_v54 = vrot.slane %v1891_v28, 6 }
 0x142   :  { %v1912_v24 = vadd.f32 %v225_v55, %v1808_v60  ;;  %v506_v53 = vrot.slane %v1897_v61, 5  ;;  %v581_v56 = vrot.slane %v1897_v61, 6  ;;  %v642_v52 = vrot.slane %v1891_v28, 7 }
 0x143   :  { %v1359_v63 = vpop.eup %1358  ;;  %1364 = vtanh.f32 %v1906_v30  ;;  %v493_v50 = vsel %vm264_vm4, %v492_v19, %v491_v3  ;;  %v494_v57 = vrot.slane %v1906_v30, 4  ;;  %v568_v27 = vsel %vm264_vm4, %v567_v54, %v566_v1 }
 0x144   :  { %v257_v9 = vrot.slane %v1359_v63, 6  ;;  %v507_v55 = vsel %vm264_vm4, %v506_v53, %v505_v20  ;;  %v508_v51 = vrot.slane %v1912_v24, 4  ;;  %v569_v49 = vrot.slane %v1906_v30, 5 }
 0x145   :  { %v1361_v48 = vpop.eup %1360  ;;  %v495_v47 = vsel %vm267_vm5, %v494_v57, %v493_v50  ;;  %v582_v46 = vsel %vm264_vm4, %v581_v56, %v580_v29  ;;  %v583_v45 = vrot.slane %v1912_v24, 5  ;;  %v643_v3 = vsel %vm264_vm4, %v642_v52, %v641_v13 }
 0x146   :  { %v229_v19 = vpop.f32.mrb[12].mxu0  ;;  %v259_v44 = vsel %vm258_vm2, %v257_v9, %v256_v5  ;;  %v260_v1 = vrot.slane %v1361_v48, 5  ;;  %v509_v54 = vsel %vm267_vm5, %v508_v51, %v507_v55  ;;  %v570_v20 = vsel %vm267_vm5, %v569_v49, %v568_v27 }
 0x147   :  { %v1932_v53 = vadd.f32 %v229_v19, %v1806_v59  ;;  %v231_v63 = vpop.f32.mrb[13].mxu0  ;;  %v584_v50 = vsel %vm267_vm5, %v583_v45, %v582_v46  ;;  %v644_v29 = vrot.slane %v1906_v30, 6  ;;  %v656_v56 = vrot.slane %v1897_v61, 7 }
 0x148   :  { %v1938_v13 = vadd.f32 %v231_v63, %v1808_v60  ;;  %v233_v52 = vpop.f32.mrb[14].mxu0  ;;  %v262_v48 = vsel %vm261_vm3, %v260_v1, %v259_v44  ;;  %v658_v51 = vrot.slane %v1912_v24, 6  ;;  %v717_v49 = vsel %vm261_vm3, %v716_v25, %v715_v8 }
 0x149   :  { %v1944_v9 = vadd.f32 %v233_v52, %v1806_v59  ;;  %v235_v5 = vpop.f32.mrb[15].mxu0  ;;  %1366 = vtanh.f32 %v1932_v53  ;;  %v496_v45 = vrot.slane %v1932_v53, 3  ;;  %v571_v46 = vrot.slane %v1932_v53, 4 }
 0x14a   :  { %v1950_v57 = vadd.f32 %v235_v5, %v1808_v60  ;;  %v510_v27 = vrot.slane %v1938_v13, 3  ;;  %v585_v44 = vrot.slane %v1938_v13, 4  ;;  %v645_v55 = vsel %vm267_vm5, %v644_v29, %v643_v3 }
 0x14b   :  { %v1363_v25 = vpop.eup %1362  ;;  %1368 = vtanh.f32 %v1944_v9  ;;  %v497_v59 = vsel %vm270_vm6, %v496_v45, %v495_v47  ;;  %v498_v8 = vrot.slane %v1944_v9, 2  ;;  %v572_v19 = vsel %vm270_vm6, %v571_v46, %v570_v20 }
 0x14c   :  { %v263_v1 = vrot.slane %v1363_v25, 4  ;;  %v511_v63 = vsel %vm270_vm6, %v510_v27, %v509_v54  ;;  %v512_v60 = vrot.slane %v1950_v57, 2  ;;  %v573_v52 = vrot.slane %v1944_v9, 3 }
 0x14d   :  { %v1365_v5 = vpop.eup %1364  ;;  %v1963_v43 = vsel %vm273_vm7, %v498_v8, %v497_v59  ;;  %v586_v3 = vsel %vm270_vm6, %v585_v44, %v584_v50  ;;  %v587_v29 = vrot.slane %v1950_v57, 3  ;;  %v646_v47 = vrot.slane %v1932_v53, 5 }
 0x14e   :  { %v265_v45 = vsel %vm264_vm4, %v263_v1, %v262_v48  ;;  %v266_v20 = vrot.slane %v1365_v5, 3  ;;  %v1970_v46 = vsel %vm273_vm7, %v512_v60, %v511_v63  ;;  %v1973_v54 = vsel %vm273_vm7, %v573_v52, %v572_v19 }
 0x14f   :  { %v1976_v27 = vsel %vm273_vm7, %v587_v29, %v586_v3  ;;  %v647_v25 = vsel %vm270_vm6, %v646_v47, %v645_v55  ;;  %v648_v50 = vrot.slane %v1944_v9, 4  ;;  %v657_v44 = vsel %vm264_vm4, %v656_v56, %v1902_v11 }
 0x150   :  { %v268_v59 = vsel %vm267_vm5, %v266_v20, %v265_v45  ;;  %v659_v48 = vsel %vm267_vm5, %v658_v51, %v657_v44  ;;  %v660_v8 = vrot.slane %v1938_v13, 5  ;;  %v662_v1 = vrot.slane %v1950_v57, 4 }
 0x151   :  { %v1987_v19 = vsel %vm273_vm7, %v648_v50, %v647_v25  ;;  %v718_v63 = vsel %vm264_vm4, %v1891_v28, %v717_v49  ;;  %v719_v55 = vrot.slane %v1906_v30, 7  ;;  %v721_v60 = vrot.slane %v1932_v53, 6 }
 0x152   :  { %v661_v11 = vsel %vm270_vm6, %v660_v8, %v659_v48  ;;  %v723_v56 = vrot.slane %v1944_v9, 5  ;;  %v2372_v51 = vrot.slane %v1853_v4, 2  ;;  %v730_v5 = vrot.slane %v1868_v26, 1 }
 0x153   :  { %v1367_v3 = vpop.eup %1366  ;;  %v2001_v29 = vsel %vm273_vm7, %v662_v1, %v661_v11  ;;  %v720_v49 = vsel %vm267_vm5, %v719_v55, %v718_v63  ;;  %v733_v47 = vrot.slane %v1912_v24, 7  ;;  %v735_v45 = vrot.slane %v1938_v13, 6 }
 0x154   :  { %v729_v52 = vsel %vm258_vm2, %v2372_v51, %v1856_v7  ;;  %v269_v20 = vrot.slane %v1367_v3, 2  ;;  %v722_v25 = vsel %vm270_vm6, %v721_v60, %v720_v49  ;;  %v737_v44 = vrot.slane %v1950_v57, 5 }
 0x155   :  { %v731_v50 = vsel %vm261_vm3, %v730_v5, %v729_v52  ;;  %v1369_v7 = vpop.eup %1368  ;;  %v2010_v48 = vsel %vm273_vm7, %v723_v56, %v722_v25  ;;  %v2373_v1 = vrot.slane %v1811_v62, 5  ;;  %v2374_v63 = vrot.slane %v1818_v2, 4 }
 0x156   :  { %v732_v8 = vsel %vm264_vm4, %v1897_v61, %v731_v50  ;;  %v789_v11 = vrot.slane %v1847_v58, 3  ;;  %v271_v60 = vsel %vm270_vm6, %v269_v20, %v268_v59  ;;  %v272_v51 = vrot.slane %v1369_v7, 1 }
 0x157   :  { %v788_v55 = vsel %vm255_vm1, %v2374_v63, %v2373_v1  ;;  %v734_v52 = vsel %vm267_vm5, %v733_v47, %v732_v8  ;;  %v791_v5 = vrot.slane %v1861_v16, 2  ;;  %v793_v49 = vrot.slane %v1891_v28, 1 }
 0x158   :  { %v736_v56 = vsel %vm270_vm6, %v735_v45, %v734_v52  ;;  %v790_v3 = vsel %vm258_vm2, %v789_v11, %v788_v55  ;;  %v796_v25 = vrot.slane %v1932_v53, 7  ;;  %v274_v50 = vsel %vm273_vm7, %v272_v51, %v271_v60 }
 0x159   :  { %v2029_v1 = vsel %vm273_vm7, %v737_v44, %v736_v56  ;;  %v792_v59 = vsel %vm261_vm3, %v791_v5, %v790_v3  ;;  %v798_v20 = vrot.slane %v1944_v9, 6  ;;  %v276_v47 = vpack.c.bf16 %v274_v50, %v274_v50 }
 0x15a   :  { %v794_v7 = vsel %vm264_vm4, %v793_v49, %v792_v59  ;;  %v2375_v45 = vrot.slane %v1814_v0, 5  ;;  %v2376_v8 = vrot.slane %v1823_v6, 4  ;;  %v803_v55 = vrot.slane %v1853_v4, 3 }
 0x15b   :  { %v795_v11 = vsel %vm267_vm5, %v1906_v30, %v794_v7  ;;  %v805_v44 = vrot.slane %v1868_v26, 2  ;;  %v807_v60 = vrot.slane %v1897_v61, 1  ;;  %v810_v51 = vrot.slane %v1938_v13, 7  ;;  %549 = vmatmul.mubr.bf16.vlgmr.msra.gmra.mrb[0].mxu1 %v276_v47 }
 0x15c   :  { %v802_v63 = vsel %vm255_vm1, %v2376_v8, %v2375_v45  ;;  %v797_v52 = vsel %vm270_vm6, %v796_v25, %v795_v11  ;;  %v812_v56 = vrot.slane %v1950_v57, 6  ;;  %v861_v3 = vrot.slane %v1811_v62, 6  ;;  %667 = vmatpush1.bf16.msra.mxu1 %v1671_v10 }
 0x15d   :  { %v804_v5 = vsel %vm258_vm2, %v803_v55, %v802_v63  ;;  %v2051_v49 = vsel %vm273_vm7, %v798_v20, %v797_v52  ;;  %v862_v59 = vrot.slane %v1818_v2, 5  ;;  %v864_v7 = vrot.slane %v1847_v58, 4  ;;  %668 = vmatprep.subr.bf16.mxu1 %v1674_v12 }
 0x15e   :  { %2377 = vst [vmem:[#allocation26_spill] sm:$0xff] %v2051_v49  ;;  %v806_v50 = vsel %vm261_vm3, %v805_v44, %v804_v5  ;;  %v866_v47 = vrot.slane %v1861_v16, 3  ;;  %v868_v45 = vrot.slane %v1891_v28, 2  ;;  %v870_v8 = vrot.slane %v1906_v30, 1 }
 0x15f   :  { %v808_v25 = vsel %vm264_vm4, %v807_v60, %v806_v50  ;;  %v863_v63 = vsel %vm255_vm1, %v862_v59, %v861_v3  ;;  %v873_v55 = vrot.slane %v1944_v9, 7  ;;  %v875_v11 = vrot.slane %v1814_v0, 6 }
 0x160   :  { %v809_v20 = vsel %vm267_vm5, %v1912_v24, %v808_v25  ;;  %v865_v52 = vsel %vm258_vm2, %v864_v7, %v863_v63  ;;  %v876_v60 = vrot.slane %v1823_v6, 5  ;;  %v878_v5 = vrot.slane %v1853_v4, 4  ;;  %669 = vmatpush1.bf16.msra.mxu1 %v1677_v14 }
 0x161   :  { %v811_v44 = vsel %vm270_vm6, %v810_v51, %v809_v20  ;;  %v867_v25 = vsel %vm261_vm3, %v866_v47, %v865_v52  ;;  %v880_v3 = vrot.slane %v1868_v26, 3  ;;  %v882_v59 = vrot.slane %v1897_v61, 2  ;;  %670 = vmatprep.subr.bf16.mxu1 %v1680_v15 }
 0x162   :  { %v2072_v50 = vsel %vm273_vm7, %v812_v56, %v811_v44  ;;  %v869_v51 = vsel %vm264_vm4, %v868_v45, %v867_v25  ;;  %v877_v7 = vsel %vm255_vm1, %v876_v60, %v875_v11  ;;  %v884_v20 = vrot.slane %v1912_v24, 1 }
 0x163   :  { %2378 = vst [vmem:[#allocation27_spill] sm:$0xff] %v2072_v50  ;;  %v887_v63 = vrot.slane %v1950_v57, 7  ;;  %v871_v49 = vsel %vm267_vm5, %v870_v8, %v869_v51  ;;  %v879_v56 = vsel %vm258_vm2, %v878_v5, %v877_v7  ;;  %v936_v47 = vrot.slane %v1811_v62, 7 }
 0x164   :  { %v937_v44 = vrot.slane %v1818_v2, 6  ;;  %v872_v52 = vsel %vm270_vm6, %v1932_v53, %v871_v49  ;;  %v881_v50 = vsel %vm261_vm3, %v880_v3, %v879_v56  ;;  %v939_v45 = vrot.slane %v1847_v58, 5  ;;  %671 = vmatpush1.bf16.msra.mxu1 %v1682_v17 }
 0x165   :  { %v941_v11 = vrot.slane %v1861_v16, 4  ;;  %v2093_v60 = vsel %vm273_vm7, %v873_v55, %v872_v52  ;;  %v883_v8 = vsel %vm264_vm4, %v882_v59, %v881_v50  ;;  %v943_v2 = vrot.slane %v1891_v28, 3  ;;  %672 = vmatprep.subr.bf16.mxu1 %v1684_v18  ;;  %v2382_v52 = vld [vmem:[#allocation19_spill] sm:$0xff] }
 0x166   :  { %v938_v62 = vsel %vm255_vm1, %v937_v44, %v936_v47  ;;  %v885_v49 = vsel %vm267_vm5, %v884_v20, %v883_v8  ;;  %v945_v58 = vrot.slane %v1906_v30, 2  ;;  %v947_v16 = vrot.slane %v1932_v53, 1  ;;  %v2385_v8 = vld [vmem:[#allocation22_spill] sm:$0xff] }
 0x167   :  { %v940_v5 = vsel %vm258_vm2, %v939_v45, %v938_v62  ;;  %v886_v55 = vsel %vm270_vm6, %v1938_v13, %v885_v49  ;;  %v950_v50 = vrot.slane %v1814_v0, 7  ;;  %v951_v3 = vrot.slane %v1823_v6, 6  ;;  %v2383_v45 = vld [vmem:[#allocation20_spill] sm:$0xff]  ;;  %v2386_v62 = vld [vmem:[#allocation23_spill] sm:$0xff]  ;;  %v2388_v49 = vld [vmem:[#allocation25_spill] sm:$0xff] }
 0x168   :  { %v942_v25 = vsel %vm261_vm3, %v941_v11, %v940_v5  ;;  %v2109_v28 = vsel %vm273_vm7, %v887_v63, %v886_v55  ;;  %v953_v51 = vrot.slane %v1853_v4, 5  ;;  %v955_v30 = vrot.slane %v1868_v26, 4  ;;  %673 = vmatpush1.bf16.msra.mxu1 %v1689_v21  ;;  %v2384_v11 = vld [vmem:[#allocation21_spill] sm:$0xff]  ;;  %v2389_v5 = vld [vmem:[#allocation15_spill] sm:$0xff] }
 0x169   :  { %v944_v59 = vsel %vm264_vm4, %v943_v2, %v942_v25  ;;  %v952_v7 = vsel %vm255_vm1, %v951_v3, %v950_v50  ;;  %v957_v20 = vrot.slane %v1897_v61, 3  ;;  %v959_v0 = vrot.slane %v1912_v24, 2  ;;  %674 = vmatprep.subr.bf16.mxu1 %v1692_v22  ;;  %v2387_v2 = vld [vmem:[#allocation24_spill] sm:$0xff] }
 0x16a   :  { %v946_v53 = vsel %vm267_vm5, %v945_v58, %v944_v59  ;;  %v954_v63 = vsel %vm258_vm2, %v953_v51, %v952_v7  ;;  %v961_v4 = vrot.slane %v1938_v13, 1  ;;  %v2379_v13 = vld [vmem:[#allocation16_spill] sm:$0xff] }
 0x16b   :  { %v948_v6 = vsel %vm270_vm6, %v947_v16, %v946_v53  ;;  %v956_v56 = vsel %vm261_vm3, %v955_v30, %v954_v63  ;;  %v2200_v63 = vld [vmem:[#allocation7 + $0x14] ss:$8 sps:$4 sm:$0xff]  }
 0x16c   :  { %v2125_v26 = vsel %vm273_vm7, %v1944_v9, %v948_v6  ;;  %v958_v47 = vsel %vm264_vm4, %v957_v20, %v956_v56  ;;  %675 = vmatpush1.bf16.msra.mxu1 %v1697_v23  ;;  %v2380_v9 = vld [vmem:[#allocation17_spill] sm:$0xff]  ;;  %v2197_v6 = vld [vmem:[#allocation7] ss:$8 sps:$4 sm:$0xff]  }
 0x16d   :  { %v960_v61 = vsel %vm267_vm5, %v959_v0, %v958_v47  ;;  %676 = vmatprep.subr.bf16.mxu1 %v1713_v31  ;;  %v2212_v56 = vld [vmem:[#allocation7 + $0x34] ss:$8 sps:$4 sm:$0xff]  }
 0x16e   :  { %v962_v24 = vsel %vm270_vm6, %v961_v4, %v960_v61  ;;  %v2209_v4 = vld [vmem:[#allocation7 + $0x20] ss:$8 sps:$4 sm:$0xff]  }
 0x16f   :  { %v2135_v44 = vsel %vm273_vm7, %v1950_v57, %v962_v24  ;;  %v2381_v57 = vld [vmem:[#allocation18_spill] sm:$0xff] }
 0x170   :  { %677 = vmatpush1.bf16.msra.mxu1 %v1715_v32 }
 0x171   :  { %678 = vmatprep.subr.bf16.mxu1 %v1721_v33 }
 0x174   :  { %679 = vmatpush1.bf16.msra.mxu1 %v1723_v34 }
 0x175   :  { %680 = vmatprep.subr.bf16.mxu1 %v1729_v35 }
 0x178   :  { %681 = vmatpush1.bf16.msra.mxu1 %v1731_v36 }
 0x179   :  { %682 = vmatprep.subr.bf16.mxu1 %v1737_v37 }
 0x17c   :  { %683 = vmatpush1.bf16.msra.mxu1 %v1739_v38 }
 0x17d   :  { %684 = vmatprep.subr.bf16.mxu1 %v1745_v39 }
 0x180   :  { %685 = vmatpush1.bf16.msra.mxu1 %v1747_v40 }
 0x181   :  { %686 = vmatprep.subr.bf16.mxu1 %v1753_v41 }
 0x184   :  { %687 = vmatpush1.bf16.msra.mxu1 %v1755_v42 }
 0x185   :  { %688 = vmatprep.subr.bf16.mxu1 %v2379_v13 }
 0x188   :  { %689 = vmatpush1.bf16.msra.mxu1 %v2380_v9 }
 0x189   :  { %690 = vmatprep.subr.bf16.mxu1 %v2381_v57 }
 0x18c   :  { %691 = vmatpush1.bf16.msra.mxu1 %v2382_v52 }
 0x18d   :  { %692 = vmatprep.subr.bf16.mxu1 %v2383_v45 }
 0x190   :  { %693 = vmatpush1.bf16.msra.mxu1 %v2384_v11 }
 0x191   :  { %694 = vmatprep.subr.bf16.mxu1 %v2385_v8 }
 0x194   :  { %695 = vmatpush1.bf16.msra.mxu1 %v2386_v62 }
 0x195   :  { %696 = vmatprep.subr.bf16.mxu1 %v2387_v2 }
 0x198   :  { %697 = vmatpush1.bf16.msra.mxu1 %v2388_v49 }
 0x199   :  { %816 = vmatprep.subr.bf16.mxu1 %v2389_v5 }
 0x22e   :  { %v550_v58 = vpop.f32.mrb[0].mxu1 }
 0x22f   :  { %v551_v16 = vadd.f32 %v550_v58, %v1963_v43  ;;  %v552_v55 = vpop.f32.mrb[1].mxu1 }
 0x230   :  { %v553_v25 = vadd.f32 %v552_v55, %v1970_v46  ;;  %v554_v50 = vpop.f32.mrb[2].mxu1 }
 0x231   :  { %1370 = vtanh.f32 %v551_v16  ;;  %v555_v3 = vpop.f32.mrb[3].mxu1  ;;  %v1416_v50 = vld [vmem:[#allocation7 + $0x84] ss:$8 sps:$4 sm:$0xff]  }
 0x232   :  { %1372 = vtanh.f32 %v553_v25  ;;  %v2255_v25 = vld [vmem:[#allocation7 + $0x40] ss:$8 sps:$4 sm:$0xff]  }
 0x233   :  { %v1417_v3 = vld [vmem:[#allocation7 + $0x80] ss:$8 sps:$4 sm:$0xff]  }
 0x23b   :  { %v1371_v59 = vpop.eup %1370 }
 0x23c   :  { %v1373_v51 = vpop.eup %1372  ;;  %v559_v53 = vpack.c.bf16 %v1371_v59, %v1371_v59  ;;  %v1418_v59 = vld [vmem:[#allocation7 + $0x94] ss:$8 sps:$4 sm:$0xff]  }
 0x23d   :  { %v560_v30 = vpack.c.bf16 %v1373_v51, %v1373_v51  ;;  %v1419_v51 = vld [vmem:[#allocation7 + $0x90] ss:$8 sps:$4 sm:$0xff]  }
 0x23f   :  { %623 = vmatprep.mubr.bf16.mxu0 %v560_v30  ;;  %v1420_v30 = vld [vmem:[#allocation7 + $0xa4] ss:$8 sps:$4 sm:$0xff]  }
 0x240   :  { %624 = vmatmul.mubr.bf16.vlgmr.msra.gmra.mrb[16].mxu0 %v559_v53  ;;  %v1421_v53 = vld [vmem:[#allocation7 + $0xa0] ss:$8 sps:$4 sm:$0xff]  }
 0x241   :  { %742 = vmatpush1.bf16.msra.mxu0 %v1671_v10  ;;  %v2192_v10 = vld [vmem:[#allocation7 + $0x4] ss:$8 sps:$4 sm:$0xff]  }
 0x242   :  { %743 = vmatprep.subr.bf16.mxu0 %v1674_v12 }
 0x245   :  { %744 = vmatpush1.bf16.msra.mxu0 %v1677_v14 }
 0x246   :  { %745 = vmatprep.subr.bf16.mxu0 %v1680_v15 }
 0x249   :  { %746 = vmatpush1.bf16.msra.mxu0 %v1682_v17 }
 0x24a   :  { %747 = vmatprep.subr.bf16.mxu0 %v1684_v18 }
 0x24d   :  { %748 = vmatpush1.bf16.msra.mxu0 %v1689_v21 }
 0x24e   :  { %749 = vmatprep.subr.bf16.mxu0 %v1692_v22 }
 0x251   :  { %750 = vmatpush1.bf16.msra.mxu0 %v1697_v23 }
 0x252   :  { %751 = vmatprep.subr.bf16.mxu0 %v1713_v31 }
 0x255   :  { %752 = vmatpush1.bf16.msra.mxu0 %v1715_v32 }
 0x256   :  { %753 = vmatprep.subr.bf16.mxu0 %v1721_v33 }
 0x259   :  { %754 = vmatpush1.bf16.msra.mxu0 %v1723_v34 }
 0x25a   :  { %755 = vmatprep.subr.bf16.mxu0 %v1729_v35 }
 0x25d   :  { %756 = vmatpush1.bf16.msra.mxu0 %v1731_v36 }
 0x25e   :  { %757 = vmatprep.subr.bf16.mxu0 %v1737_v37 }
 0x261   :  { %758 = vmatpush1.bf16.msra.mxu0 %v1739_v38 }
 0x262   :  { %759 = vmatprep.subr.bf16.mxu0 %v1745_v39 }
 0x265   :  { %760 = vmatpush1.bf16.msra.mxu0 %v1747_v40 }
 0x266   :  { %761 = vmatprep.subr.bf16.mxu0 %v1753_v41 }
 0x269   :  { %762 = vmatpush1.bf16.msra.mxu0 %v1755_v42 }
 0x26a   :  { %763 = vmatprep.subr.bf16.mxu0 %v2379_v13 }
 0x26d   :  { %764 = vmatpush1.bf16.msra.mxu0 %v2380_v9 }
 0x26e   :  { %765 = vmatprep.subr.bf16.mxu0 %v2381_v57 }
 0x271   :  { %766 = vmatpush1.bf16.msra.mxu0 %v2382_v52 }
 0x272   :  { %767 = vmatprep.subr.bf16.mxu0 %v2383_v45 }
 0x275   :  { %768 = vmatpush1.bf16.msra.mxu0 %v2384_v11 }
 0x276   :  { %769 = vmatprep.subr.bf16.mxu0 %v2385_v8 }
 0x279   :  { %770 = vmatpush1.bf16.msra.mxu0 %v2386_v62 }
 0x27a   :  { %771 = vmatprep.subr.bf16.mxu0 %v2387_v2 }
 0x27d   :  { %772 = vmatpush1.bf16.msra.mxu0 %v2388_v49 }
 0x27e   :  { %891 = vmatprep.subr.bf16.mxu0 %v2192_v10 }
 0x313   :  { %v625_v12 = vpop.f32.mrb[16].mxu0 }
 0x314   :  { %v626_v14 = vadd.f32 %v625_v12, %v1973_v54  ;;  %v627_v15 = vpop.f32.mrb[17].mxu0  ;;  %v2203_v54 = vld [vmem:[#allocation7 + $0x10] ss:$8 sps:$4 sm:$0xff]  }
 0x315   :  { %v628_v17 = vadd.f32 %v627_v15, %v1976_v27  ;;  %v629_v18 = vpop.f32.mrb[18].mxu0  ;;  %v2206_v27 = vld [vmem:[#allocation7 + $0x24] ss:$8 sps:$4 sm:$0xff]   ;;  %v1423_v12 = vld [vmem:[#allocation7 + $0xb0] ss:$8 sps:$4 sm:$0xff]  }
 0x316   :  { %1374 = vtanh.f32 %v626_v14  ;;  %v630_v43 = vpop.f32.mrb[19].mxu0  ;;  %v2390_v15 = vld [vmem:[#allocation26_spill] sm:$0xff] }
 0x317   :  { %1376 = vtanh.f32 %v628_v17  ;;  %v2391_v43 = vld [vmem:[#allocation27_spill] sm:$0xff] }
 0x320   :  { %v1375_v46 = vpop.eup %1374 }
 0x321   :  { %v1377_v7 = vpop.eup %1376  ;;  %v634_v0 = vpack.c.bf16 %v1375_v46, %v1375_v46 }
 0x322   :  { %v635_v20 = vpack.c.bf16 %v1377_v7, %v1377_v7 }
 0x324   :  { %698 = vmatprep.mubr.bf16.mxu1 %v635_v20  ;;  %v1427_v20 = vld [vmem:[#allocation7 + $0xd0] ss:$8 sps:$4 sm:$0xff]  }
 0x325   :  { %699 = vmatmul.mubr.bf16.vlgmr.msra.gmra.mrb[4].mxu1 %v634_v0  ;;  %v1428_v0 = vld [vmem:[#allocation7 + $0xe4] ss:$8 sps:$4 sm:$0xff]  }
 0x326   :  { %817 = vmatpush1.bf16.msra.mxu1 %v2197_v6 }
 0x327   :  { %818 = vmatprep.subr.bf16.mxu1 %v2200_v63 }
 0x32a   :  { %819 = vmatpush1.bf16.msra.mxu1 %v2203_v54 }
 0x32b   :  { %820 = vmatprep.subr.bf16.mxu1 %v2206_v27 }
 0x32e   :  { %821 = vmatpush1.bf16.msra.mxu1 %v2209_v4 }
 0x32f   :  { %822 = vmatprep.subr.bf16.mxu1 %v2212_v56 }
 0x332   :  { %823 = vmatpush1.bf16.msra.mxu1 %v1689_v21 }
 0x333   :  { %824 = vmatprep.subr.bf16.mxu1 %v1692_v22 }
 0x336   :  { %825 = vmatpush1.bf16.msra.mxu1 %v1697_v23 }
 0x337   :  { %826 = vmatprep.subr.bf16.mxu1 %v1713_v31 }
 0x33a   :  { %827 = vmatpush1.bf16.msra.mxu1 %v1715_v32 }
 0x33b   :  { %828 = vmatprep.subr.bf16.mxu1 %v1721_v33 }
 0x33e   :  { %829 = vmatpush1.bf16.msra.mxu1 %v1723_v34 }
 0x33f   :  { %830 = vmatprep.subr.bf16.mxu1 %v1729_v35 }
 0x342   :  { %831 = vmatpush1.bf16.msra.mxu1 %v1731_v36 }
 0x343   :  { %832 = vmatprep.subr.bf16.mxu1 %v1737_v37 }
 0x346   :  { %833 = vmatpush1.bf16.msra.mxu1 %v1739_v38 }
 0x347   :  { %834 = vmatprep.subr.bf16.mxu1 %v1745_v39 }
 0x34a   :  { %835 = vmatpush1.bf16.msra.mxu1 %v1747_v40 }
 0x34b   :  { %836 = vmatprep.subr.bf16.mxu1 %v1753_v41 }
 0x34e   :  { %837 = vmatpush1.bf16.msra.mxu1 %v1755_v42 }
 0x34f   :  { %838 = vmatprep.subr.bf16.mxu1 %v2379_v13 }
 0x352   :  { %839 = vmatpush1.bf16.msra.mxu1 %v2380_v9 }
 0x353   :  { %840 = vmatprep.subr.bf16.mxu1 %v2381_v57 }
 0x356   :  { %841 = vmatpush1.bf16.msra.mxu1 %v2382_v52 }
 0x357   :  { %842 = vmatprep.subr.bf16.mxu1 %v2383_v45 }
 0x35a   :  { %843 = vmatpush1.bf16.msra.mxu1 %v2384_v11 }
 0x35b   :  { %844 = vmatprep.subr.bf16.mxu1 %v2385_v8 }
 0x35e   :  { %845 = vmatpush1.bf16.msra.mxu1 %v2386_v62 }
 0x35f   :  { %846 = vmatprep.subr.bf16.mxu1 %v2387_v2 }
 0x362   :  { %847 = vmatpush1.bf16.msra.mxu1 %v2388_v49 }
 0x363   :  { %966 = vmatprep.subr.bf16.mxu1 %v2192_v10 }
 0x3f8   :  { %v700_v21 = vpop.f32.mrb[4].mxu1 }
 0x3f9   :  { %v701_v22 = vadd.f32 %v700_v21, %v1987_v19  ;;  %v702_v23 = vpop.f32.mrb[5].mxu1  ;;  %v2249_v19 = vld [vmem:[#allocation7 + $0x30] ss:$8 sps:$4 sm:$0xff]  }
 0x3fa   :  { %v703_v47 = vadd.f32 %v702_v23, %v2001_v29  ;;  %v704_v61 = vpop.f32.mrb[6].mxu1  ;;  %v2252_v29 = vld [vmem:[#allocation7 + $0x44] ss:$8 sps:$4 sm:$0xff]  }
 0x3fb   :  { %1378 = vtanh.f32 %v701_v22  ;;  %v705_v24 = vpop.f32.mrb[7].mxu1 }
 0x3fc   :  { %1380 = vtanh.f32 %v703_v47 }
 0x405   :  { %v1379_v5 = vpop.eup %1378 }
 0x406   :  { %v1381_v58 = vpop.eup %1380  ;;  %v709_v55 = vpack.c.bf16 %v1379_v5, %v1379_v5 }
 0x407   :  { %v710_v16 = vpack.c.bf16 %v1381_v58, %v1381_v58  ;;  %v1346_v58 = vld [vmem:[#allocation8] sm:$0xff]  }
 0x409   :  { %773 = vmatprep.mubr.bf16.mxu0 %v710_v16  ;;  %v1560_v16 = vmov 0.0  }
 0x40a   :  { %774 = vmatmul.mubr.bf16.vlgmr.msra.gmra.mrb[20].mxu0 %v709_v55  ;;  %v1347_v55 = vld [vmem:[#allocation8 + $0x8] sm:$0xff]  }
 0x40b   :  { %892 = vmatpush1.bf16.msra.mxu0 %v2197_v6 }
 0x40c   :  { %893 = vmatprep.subr.bf16.mxu0 %v2200_v63 }
 0x40f   :  { %894 = vmatpush1.bf16.msra.mxu0 %v2203_v54 }
 0x410   :  { %895 = vmatprep.subr.bf16.mxu0 %v2206_v27 }
 0x413   :  { %896 = vmatpush1.bf16.msra.mxu0 %v2209_v4 }
 0x414   :  { %897 = vmatprep.subr.bf16.mxu0 %v2212_v56 }
 0x417   :  { %898 = vmatpush1.bf16.msra.mxu0 %v2249_v19 }
 0x418   :  { %899 = vmatprep.subr.bf16.mxu0 %v2252_v29 }
 0x41b   :  { %900 = vmatpush1.bf16.msra.mxu0 %v2255_v25 }
 0x41c   :  { %901 = vmatprep.subr.bf16.mxu0 %v1713_v31 }
 0x41f   :  { %902 = vmatpush1.bf16.msra.mxu0 %v1715_v32 }
 0x420   :  { %903 = vmatprep.subr.bf16.mxu0 %v1721_v33 }
 0x423   :  { %904 = vmatpush1.bf16.msra.mxu0 %v1723_v34 }
 0x424   :  { %905 = vmatprep.subr.bf16.mxu0 %v1729_v35 }
 0x427   :  { %906 = vmatpush1.bf16.msra.mxu0 %v1731_v36 }
 0x428   :  { %907 = vmatprep.subr.bf16.mxu0 %v1737_v37 }
 0x42b   :  { %908 = vmatpush1.bf16.msra.mxu0 %v1739_v38 }
 0x42c   :  { %909 = vmatprep.subr.bf16.mxu0 %v1745_v39 }
 0x42f   :  { %910 = vmatpush1.bf16.msra.mxu0 %v1747_v40 }
 0x430   :  { %911 = vmatprep.subr.bf16.mxu0 %v1753_v41  ;;  %v1410_v41 = vld [vmem:[#allocation7 + $0x54] ss:$8 sps:$4 sm:$0xff]  }
 0x433   :  { %912 = vmatpush1.bf16.msra.mxu0 %v1755_v42  ;;  %v1411_v42 = vld [vmem:[#allocation7 + $0x50] ss:$8 sps:$4 sm:$0xff]  }
 0x434   :  { %913 = vmatprep.subr.bf16.mxu0 %v2379_v13  ;;  %v1414_v13 = vld [vmem:[#allocation7 + $0x74] ss:$8 sps:$4 sm:$0xff]  }
 0x437   :  { %914 = vmatpush1.bf16.msra.mxu0 %v2380_v9  ;;  %v1415_v9 = vld [vmem:[#allocation7 + $0x70] ss:$8 sps:$4 sm:$0xff]  }
 0x438   :  { %915 = vmatprep.subr.bf16.mxu0 %v2381_v57 }
 0x43b   :  { %916 = vmatpush1.bf16.msra.mxu0 %v2382_v52 }
 0x43c   :  { %917 = vmatprep.subr.bf16.mxu0 %v2383_v45 }
 0x43f   :  { %918 = vmatpush1.bf16.msra.mxu0 %v2384_v11 }
 0x440   :  { %919 = vmatprep.subr.bf16.mxu0 %v2385_v8 }
 0x443   :  { %920 = vmatpush1.bf16.msra.mxu0 %v2386_v62 }
 0x444   :  { %921 = vmatprep.subr.bf16.mxu0 %v2387_v2 }
 0x447   :  { %922 = vmatpush1.bf16.msra.mxu0 %v2388_v49 }
 0x448   :  { %1011 = vmatprep.subr.bf16.mxu0 %v2192_v10  ;;  %v1422_v10 = vld [vmem:[#allocation7 + $0xb4] ss:$8 sps:$4 sm:$0xff]  }
 0x4dd   :  { %v775_v31 = vpop.f32.mrb[20].mxu0 }
 0x4de   :  { %v776_v32 = vadd.f32 %v775_v31, %v2010_v48  ;;  %v777_v33 = vpop.f32.mrb[21].mxu0  ;;  %v1412_v48 = vld [vmem:[#allocation7 + $0x64] ss:$8 sps:$4 sm:$0xff]  }
 0x4df   :  { %v778_v34 = vadd.f32 %v777_v33, %v2029_v1  ;;  %v779_v35 = vpop.f32.mrb[22].mxu0  ;;  %v1413_v1 = vld [vmem:[#allocation7 + $0x60] ss:$8 sps:$4 sm:$0xff]  }
 0x4e0   :  { %1382 = vtanh.f32 %v776_v32  ;;  %v780_v36 = vpop.f32.mrb[23].mxu0 }
 0x4e1   :  { %1384 = vtanh.f32 %v778_v34 }
 0x4ea   :  { %v1383_v37 = vpop.eup %1382 }
 0x4eb   :  { %v1385_v38 = vpop.eup %1384  ;;  %v784_v40 = vpack.c.bf16 %v1383_v37, %v1383_v37 }
 0x4ec   :  { %v785_v39 = vpack.c.bf16 %v1385_v38, %v1385_v38  ;;  %v1350_v38 = vld [vmem:[#allocation8 + $0x20] sm:$0xff]  }
 0x4ee   :  { %848 = vmatprep.mubr.bf16.mxu1 %v785_v39  ;;  %v1351_v39 = vld [vmem:[#allocation8 + $0x28] sm:$0xff]  }
 0x4ef   :  { %849 = vmatmul.mubr.bf16.vlgmr.msra.gmra.mrb[8].mxu1 %v784_v40  ;;  %v1234_v40 = vld [vmem:[%s2335_s2 + $0x1] ss:$0 sm:$0xff]  ;;  %s1520_s2 = scalar_lea.vmem %s1180_s28, 128 }
 0x4f0   :  { %967 = vmatpush1.bf16.msra.mxu1 %v2197_v6  ;;  %p1521_p4 = scmp.ne.s32.totalorder %s1180_s28, %s1520_s2  ;;  %p1526_p6 = scmp.lt.s32.totalorder %s1520_s2, %s1520_s2 }
 0x4f1   :  { %968 = vmatprep.subr.bf16.mxu1 %v2200_v63 }
 0x4f2   :  { %p1527_p7 = por %p1526_p6, %p1525_p5 }
 0x4f4   :  { %969 = vmatpush1.bf16.msra.mxu1 %v2203_v54  ;;  %p1528_p8 = pnand %p1527_p7, %p1521_p4 }
 0x4f5   :  { %970 = vmatprep.subr.bf16.mxu1 %v2206_v27 }
 0x4f8   :  { %971 = vmatpush1.bf16.msra.mxu1 %v2209_v4 }
 0x4f9   :  { %972 = vmatprep.subr.bf16.mxu1 %v2212_v56 }
 0x4fc   :  { %973 = vmatpush1.bf16.msra.mxu1 %v2249_v19 }
 0x4fd   :  { %974 = vmatprep.subr.bf16.mxu1 %v2252_v29 }
 0x500   :  { %975 = vmatpush1.bf16.msra.mxu1 %v2255_v25 }
 0x501   :  { %976 = vmatprep.subr.bf16.mxu1 %v1410_v41 }
 0x504   :  { %977 = vmatpush1.bf16.msra.mxu1 %v1411_v42 }
 0x505   :  { %978 = vmatprep.subr.bf16.mxu1 %v1412_v48 }
 0x508   :  { %979 = vmatpush1.bf16.msra.mxu1 %v1413_v1 }
 0x509   :  { %980 = vmatprep.subr.bf16.mxu1 %v1414_v13 }
 0x50c   :  { %981 = vmatpush1.bf16.msra.mxu1 %v1415_v9 }
 0x50d   :  { %982 = vmatprep.subr.bf16.mxu1 %v1416_v50 }
 0x510   :  { %983 = vmatpush1.bf16.msra.mxu1 %v1417_v3 }
 0x511   :  { %984 = vmatprep.subr.bf16.mxu1 %v1418_v59 }
 0x514   :  { %985 = vmatpush1.bf16.msra.mxu1 %v1419_v51 }
 0x515   :  { %986 = vmatprep.subr.bf16.mxu1 %v1420_v30 }
 0x518   :  { %987 = vmatpush1.bf16.msra.mxu1 %v1421_v53 }
 0x519   :  { %988 = vmatprep.subr.bf16.mxu1 %v1422_v10 }
 0x51c   :  { %989 = vmatpush1.bf16.msra.mxu1 %v1423_v12 }
 0x51d   :  { %990 = vmatprep.subr.bf16.mxu1 %v2381_v57 }
 0x520   :  { %991 = vmatpush1.bf16.msra.mxu1 %v2382_v52 }
 0x521   :  { %992 = vmatprep.subr.bf16.mxu1 %v2383_v45 }
 0x524   :  { %993 = vmatpush1.bf16.msra.mxu1 %v2384_v11 }
 0x525   :  { %994 = vmatprep.subr.bf16.mxu1 %v2385_v8 }
 0x528   :  { %995 = vmatpush1.bf16.msra.mxu1 %v2386_v62  ;;  %v1424_v62 = vld [vmem:[#allocation7 + $0xc4] ss:$8 sps:$4 sm:$0xff]  }
 0x529   :  { %996 = vmatprep.subr.bf16.mxu1 %v2387_v2  ;;  %v1425_v2 = vld [vmem:[#allocation7 + $0xc0] ss:$8 sps:$4 sm:$0xff]  }
 0x52c   :  { %997 = vmatpush1.bf16.msra.mxu1 %v2388_v49  ;;  %v1426_v49 = vld [vmem:[#allocation7 + $0xd4] ss:$8 sps:$4 sm:$0xff]  }
 0x52d   :  { %1253 = vmatprep.subr.bf16.mxu1 %v1560_v16 }
 0x5c2   :  { %v850_v14 = vpop.f32.mrb[8].mxu1 }
 0x5c3   :  { %v851_v17 = vadd.f32 %v850_v14, %v2390_v15  ;;  %v852_v18 = vpop.f32.mrb[9].mxu1 }
 0x5c4   :  { %v853_v57 = vadd.f32 %v852_v18, %v2391_v43  ;;  %v854_v46 = vpop.f32.mrb[10].mxu1 }
 0x5c5   :  { %1386 = vtanh.f32 %v851_v17  ;;  %v855_v52 = vpop.f32.mrb[11].mxu1 }
 0x5c6   :  { %1388 = vtanh.f32 %v853_v57 }
 0x5cf   :  { %v1387_v45 = vpop.eup %1386 }
 0x5d0   :  { %v1389_v11 = vpop.eup %1388  ;;  %v859_v8 = vpack.c.bf16 %v1387_v45, %v1387_v45 }
 0x5d1   :  { %v860_v7 = vpack.c.bf16 %v1389_v11, %v1389_v11 }
 0x5d3   :  { %923 = vmatprep.mubr.bf16.mxu0 %v860_v7 }
 0x5d4   :  { %924 = vmatmul.mubr.bf16.vlgmr.msra.gmra.mrb[24].mxu0 %v859_v8 }
 0x5d5   :  { %1012 = vmatpush1.bf16.msra.mxu0 %v2197_v6  ;;  %v1429_v6 = vld [vmem:[#allocation7 + $0xe0] ss:$8 sps:$4 sm:$0xff]  }
 0x5d6   :  { %1013 = vmatprep.subr.bf16.mxu0 %v2200_v63  ;;  %v1430_v63 = vld [vmem:[#allocation7 + $0xf4] ss:$8 sps:$4 sm:$0xff]  }
 0x5d9   :  { %1014 = vmatpush1.bf16.msra.mxu0 %v2203_v54  ;;  %v1431_v54 = vld [vmem:[#allocation7 + $0xf0] ss:$8 sps:$4 sm:$0xff]  }
 0x5da   :  { %1015 = vmatprep.subr.bf16.mxu0 %v2206_v27 }
 0x5dd   :  { %1016 = vmatpush1.bf16.msra.mxu0 %v2209_v4 }
 0x5de   :  { %1017 = vmatprep.subr.bf16.mxu0 %v2212_v56 }
 0x5e1   :  { %1018 = vmatpush1.bf16.msra.mxu0 %v2249_v19 }
 0x5e2   :  { %1019 = vmatprep.subr.bf16.mxu0 %v2252_v29 }
 0x5e5   :  { %1020 = vmatpush1.bf16.msra.mxu0 %v2255_v25 }
 0x5e6   :  { %1021 = vmatprep.subr.bf16.mxu0 %v1410_v41 }
 0x5e9   :  { %1022 = vmatpush1.bf16.msra.mxu0 %v1411_v42 }
 0x5ea   :  { %1023 = vmatprep.subr.bf16.mxu0 %v1412_v48 }
 0x5ed   :  { %1024 = vmatpush1.bf16.msra.mxu0 %v1413_v1 }
 0x5ee   :  { %1025 = vmatprep.subr.bf16.mxu0 %v1414_v13 }
 0x5f1   :  { %1026 = vmatpush1.bf16.msra.mxu0 %v1415_v9 }
 0x5f2   :  { %1027 = vmatprep.subr.bf16.mxu0 %v1416_v50 }
 0x5f5   :  { %1028 = vmatpush1.bf16.msra.mxu0 %v1417_v3  ;;  %v1235_v3 = vld [vmem:[%s2338_s5] ss:$0 sm:$0xff] }
 0x5f6   :  { %1029 = vmatprep.subr.bf16.mxu0 %v1418_v59 }
 0x5f9   :  { %1030 = vmatpush1.bf16.msra.mxu0 %v1419_v51 }
 0x5fa   :  { %1031 = vmatprep.subr.bf16.mxu0 %v1420_v30 }
 0x5fd   :  { %1032 = vmatpush1.bf16.msra.mxu0 %v1421_v53 }
 0x5fe   :  { %1033 = vmatprep.subr.bf16.mxu0 %v1422_v10 }
 0x601   :  { %1034 = vmatpush1.bf16.msra.mxu0 %v1423_v12 }
 0x602   :  { %1035 = vmatprep.subr.bf16.mxu0 %v1424_v62 }
 0x605   :  { %1036 = vmatpush1.bf16.msra.mxu0 %v1425_v2 }
 0x606   :  { %1037 = vmatprep.subr.bf16.mxu0 %v1426_v49 }
 0x609   :  { %1038 = vmatpush1.bf16.msra.mxu0 %v1427_v20 }
 0x60a   :  { %1039 = vmatprep.subr.bf16.mxu0 %v1428_v0 }
 0x60d   :  { %1040 = vmatpush1.bf16.msra.mxu0 %v1429_v6 }
 0x60e   :  { %1041 = vmatprep.subr.bf16.mxu0 %v1430_v63 }
 0x611   :  { %1042 = vmatpush1.bf16.msra.mxu0 %v1431_v54 }
 0x6a7   :  { %v925_v27 = vpop.f32.mrb[24].mxu0 }
 0x6a8   :  { %v926_v4 = vadd.f32 %v925_v27, %v2093_v60  ;;  %v927_v56 = vpop.f32.mrb[25].mxu0  ;;  %v1348_v60 = vld [vmem:[#allocation8 + $0x10] sm:$0xff]  }
 0x6a9   :  { %v928_v21 = vadd.f32 %v927_v56, %v2109_v28  ;;  %v929_v22 = vpop.f32.mrb[26].mxu0  ;;  %v1349_v28 = vld [vmem:[#allocation8 + $0x18] sm:$0xff]  }
 0x6aa   :  { %1390 = vtanh.f32 %v926_v4  ;;  %v930_v23 = vpop.f32.mrb[27].mxu0 }
 0x6ab   :  { %1392 = vtanh.f32 %v928_v21 }
 0x6b4   :  { %v1391_v47 = vpop.eup %1390 }
 0x6b5   :  { %v1393_v61 = vpop.eup %1392  ;;  %v934_v5 = vpack.c.bf16 %v1391_v47, %v1391_v47 }
 0x6b6   :  { %v935_v24 = vpack.c.bf16 %v1393_v61, %v1393_v61 }
 0x6b8   :  { %998 = vmatprep.mubr.bf16.mxu1 %v935_v24 }
 0x6b9   :  { %999 = vmatmul.mubr.bf16.vlgmr.msra.gmra.mrb[12].mxu1 %v934_v5 }
 0x6ba   :  { %1254 = vmatpush3.bf16.msra.mxu1 %v1346_v58  ;;  %1269 = vmatprep.mubr.msk.bf16.mxu1 %vm1561_vm8, %v1560_v16 }
 0x6bb   :  { %1255 = vmatprep.subr.bf16.mxu1 %v1560_v16 }
 0x6be   :  { %1256 = vmatpush3.bf16.msra.mxu1 %v1347_v55 }
 0x6bf   :  { %1257 = vmatprep.subr.bf16.mxu1 %v1560_v16 }
 0x6c2   :  { %1258 = vmatpush3.bf16.msra.mxu1 %v1348_v60 }
 0x6c3   :  { %1259 = vmatprep.subr.bf16.mxu1 %v1560_v16 }
 0x6c6   :  { %1260 = vmatpush3.bf16.msra.mxu1 %v1349_v28 }
 0x6c7   :  { %1261 = vmatprep.subr.bf16.mxu1 %v1560_v16 }
 0x6ca   :  { %1262 = vmatpush3.bf16.msra.mxu1 %v1350_v38 }
 0x6cb   :  { %1263 = vmatprep.subr.bf16.mxu1 %v1560_v16 }
 0x6ce   :  { %1264 = vmatpush3.bf16.msra.mxu1 %v1351_v39 }
 0x6cf   :  { %1265 = vmatprep.subr.bf16.mxu1 %v1560_v16 }
 0x78c   :  { %v1000_v19 = vpop.f32.mrb[12].mxu1 }
 0x78d   :  { %v1001_v29 = vadd.f32 %v1000_v19, %v2125_v26  ;;  %v1002_v25 = vpop.f32.mrb[13].mxu1  ;;  %v1352_v26 = vld [vmem:[#allocation8 + $0x30] sm:$0xff]  }
 0x78e   :  { %v1003_v31 = vadd.f32 %v1002_v25, %v2135_v44  ;;  %v1004_v32 = vpop.f32.mrb[14].mxu1  ;;  %1266 = vmatpush3.bf16.msra.mxu1 %v1352_v26  ;;  %v1353_v44 = vld [vmem:[#allocation8 + $0x38] sm:$0xff]  }
 0x78f   :  { %1394 = vtanh.f32 %v1001_v29  ;;  %v1005_v33 = vpop.f32.mrb[15].mxu1  ;;  %1267 = vmatprep.subr.bf16.mxu1 %v1560_v16 }
 0x790   :  { %1396 = vtanh.f32 %v1003_v31 }
 0x792   :  { %1268 = vmatpush3.bf16.msra.mxu1 %v1353_v44 }
 0x799   :  { %v1395_v34 = vpop.eup %1394 }
 0x79a   :  { %v1397_v35 = vpop.eup %1396  ;;  %v1009_v37 = vpack.c.bf16 %v1395_v34, %v1395_v34 }
 0x79b   :  { %v1010_v36 = vpack.c.bf16 %v1397_v35, %v1397_v35 }
 0x79d   :  { %1043 = vmatprep.mubr.bf16.mxu0 %v1010_v36 }
 0x79e   :  { %1044 = vmatmul.mubr.bf16.vlgmr.msra.gmra.mrb[28].mxu0 %v1009_v37 }
 0x871   :  { %v1045_v41 = vpop.f32.mrb[28].mxu0 }
 0x872   :  { %v1046_v42 = vpop.f32.mrb[29].mxu0 }
 0x873   :  { %v1058_v48 = vadd.f32 %v1234_v40, %v1046_v42  ;;  %v1048_v1 = vpop.f32.mrb[30].mxu0 }
 0x874   :  { %v1049_v13 = vpop.f32.mrb[31].mxu0 }
 0x875   :  { %1398 = vtanh.f32 %v1058_v48 }
 0x87f   :  { %v1399_v9 = vpop.eup %1398 }
 0x880   :  { %v1060_v50 = vpack.c.bf16 %v1399_v9, %v1399_v9 }
 0x882   :  { %1270 = vmatmul.mubr.bf16.vlgmr.msra.gmra.mrb[16].mxu1 %v1060_v50 }
 0x955   :  { %v1166_v59 = vpop.f32.mrb[16].mxu1 }
 0x956   :  { %v1167_v51 = vadd.f32 %v1235_v3, %v1166_v59  ;;  %v1271_v30 = vpop.f32.mrb[17].mxu1 }
 0x957   :  { %v1169_v53 = vpop.f32.mrb[18].mxu1 }
 0x958   :  { %1172 = vst [vmem:[#allocation10] sm:$0xff] %v1167_v51  ;;  %v1272_v10 = vpop.f32.mrb[19].mxu1 }
 0x959   :  { %1531 = shalt.err (!%p1528_p8)
}
 0x95a   :  { %s1532_s5 = scalar_lea.hbm %s2339_s6, 128 }
 0x95b   :  { %p1533_p9 = scmp.ne.s32.totalorder %s2339_s6, %s1532_s5  ;;  %p1536_p10 = scmp.lt.u32.totalorder %s1532_s5, %s2339_s6 }
 0x95d   :  { %p1538_p11 = pnand %p1536_p10, %p1533_p9 }
 0x95f   :  { %1541 = shalt.err (!%p1538_p11)
}
 0x960   :  { %1182 = dma.vmem_to_hbm [thread:$0]  %s1180_s28, 128, %s2339_s6, [#allocation4]  }
 0x961   :  { %1548 = dma.done.wait [#allocation4], 128  }
 0x962   :  { %1549 = vsyncadd [#allocation4], 4294967168 }
 0x963   :  { %1186 = vsyncpa [#allocation3], 1 }
 0x964   :  { %1187 = vsyncpa [#allocation6], 1 }
 0x965   :  { %1188 = vsyncpa [#allocation9], 1 }
 0x966   :  { %1189 = vsyncpa [#allocation4], 1 }

</bundles_post_ra>
